<compile_context>
chip_gen: v7x
topology: tpu7x:2x2x1
jax: 0.10.0
libtpu: 0.0.40
codegen_flags: <defaults>
</compile_context>

<pallas_src>
import functools

import jax
import jax.numpy as jnp
from jax import lax
from jax.experimental import pallas as pl
from jax.experimental.pallas import tpu as pltpu

_NEG_LARGE = -1e30  # finite stand-in for -inf


def _pick_tile(n, preferred=512):
    """Largest tile <= preferred that evenly divides n (full dim if n is small)."""
    if n <= preferred:
        return n
    for t in (preferred, 256, 128, 64, 32, 16, 8):
        if n % t == 0:
            return t
    return n


def _vmem_limit_bytes():
    """~3/4 of per-core VMEM: ~48 MiB on v7x, ~96 MiB on v5e/v6e."""
    try:
        cap = int(pltpu.get_tpu_info().vmem_capacity_bytes)
    except Exception:
        cap = 128 * 1024 * 1024
    return min((cap * 3) // 4, 96 * 1024 * 1024)


# ---------------------------------------------------------------------------
# Fused flash-attention + fc_out kernel.
# Grid: (batch, q-tile, kv-tile); kv-tile is the innermost ("arbitrary") axis.
# ---------------------------------------------------------------------------
def _flash_attn_fc_kernel(q_ref, k_ref, v_ref, mask_ref, w_ref, b_ref, o_ref,
                          m_sc, l_sc, acc_sc, *, heads, head_dim, scale):
    ki = pl.program_id(2)
    nk = pl.num_programs(2)

    @pl.when(ki == 0)
    def _():
        m_sc[...] = jnp.full_like(m_sc, _NEG_LARGE)
        l_sc[...] = jnp.zeros_like(l_sc)
        acc_sc[...] = jnp.zeros_like(acc_sc)

    # bf16 MXU operands, f32 accumulation. Scale folded into q (O(tq*E) muls).
    q = (q_ref[0] * scale).astype(jnp.bfloat16)   # (tq, E)
    k = k_ref[0].astype(jnp.bfloat16)             # (tk, E)
    v = v_ref[0].astype(jnp.bfloat16)             # (tk, E)

    # int8 mask (0 = masked) -> f32 additive bias, computed once per block.
    mf = mask_ref[0].astype(jnp.float32)          # (tq, tk)
    neg_bias = jnp.where(mf == 0.0, jnp.float32(_NEG_LARGE), jnp.float32(0.0))

    for h in range(heads):                         # static unroll (heads is small)
        lo = h * head_dim
        hi = lo + head_dim
        # energy = qh @ kh^T via contraction dims (no explicit transpose).
        s = lax.dot_general(q[:, lo:hi], k[:, lo:hi], (((1,), (1,)), ((), ())),
                            preferred_element_type=jnp.float32)   # (tq, tk)
        s = s + neg_bias

        m_prev = m_sc[:, h:h + 1]                                  # (tq, 1)
        l_prev = l_sc[:, h:h + 1]
        m_new = jnp.maximum(m_prev, jnp.max(s, axis=-1, keepdims=True))
        alpha = jnp.exp(m_prev - m_new)                            # f32 softmax math
        p = jnp.exp(s - m_new)                                     # (tq, tk)
        l_sc[:, h:h + 1] = alpha * l_prev + jnp.sum(p, axis=-1, keepdims=True)
        m_sc[:, h:h + 1] = m_new
        acc_sc[:, lo:hi] = alpha * acc_sc[:, lo:hi] + jnp.dot(
            p.astype(jnp.bfloat16), v[:, lo:hi],
            preferred_element_type=jnp.float32)

    @pl.when(ki == nk - 1)
    def _():
        # Per-head normalization folded into the small (tq, D) context slabs.
        for h in range(heads):
            lo = h * head_dim
            hi = lo + head_dim
            inv_l = pl.reciprocal(l_sc[:, h:h + 1], approx=True)
            acc_sc[:, lo:hi] = acc_sc[:, lo:hi] * inv_l
        # Fused fc_out epilogue: resident bf16 W^T [in, out] + bias.
        ctx = acc_sc[...].astype(jnp.bfloat16)                      # (tq, E)
        y = jnp.dot(ctx, w_ref[...], preferred_element_type=jnp.float32)
        o_ref[0] = (y + b_ref[...]).astype(o_ref.dtype)


# ---------------------------------------------------------------------------
# One-time parameter preparation (hoisted out of the per-call path).
# ---------------------------------------------------------------------------
def prepare_params(fc_w, fc_b):
    """fc_w: torch Linear layout [out, in] -> pre-transposed bf16 [in, out];
    fc_b -> (1, E) f32."""
    return fc_w.T.astype(jnp.bfloat16), fc_b.reshape(1, -1).astype(jnp.float32)


# ---------------------------------------------------------------------------
# Python wrapper replicating SelfAttention.forward
# ---------------------------------------------------------------------------
def self_attention_forward(values, keys, query, mask, fc_w_t, fc_b_2d, *, heads):
    """values/keys/query: [N, L, E] f32; mask: [N, Lq, Lk] int8/bool (0 = masked);
    fc_w_t: [E, E] bf16 pre-transposed to [in, out]; fc_b_2d: [1, E] f32."""
    N, value_len, E = values.shape
    key_len = keys.shape[1]
    query_len = query.shape[1]
    head_dim = E // heads
    assert head_dim * heads == E
    assert value_len == key_len
    scale = 1.0 / (float(E) ** 0.5)   # matches reference: 1/sqrt(embed_size)

    if mask.dtype != jnp.int8:        # prefer an int8 mask prepared by the caller
        mask = (mask != 0).astype(jnp.int8)

    tq = _pick_tile(query_len)
    tk = _pick_tile(key_len)
    grid = (N, pl.cdiv(query_len, tq), pl.cdiv(key_len, tk))

    kernel = functools.partial(_flash_attn_fc_kernel,
                               heads=heads, head_dim=head_dim, scale=scale)

    out = pl.pallas_call(
        kernel,
        out_shape=jax.ShapeDtypeStruct((N, query_len, E), jnp.float32),
        grid_spec=pltpu.PrefetchScalarGridSpec(
            num_scalar_prefetch=0,
            grid=grid,
            in_specs=[
                pl.BlockSpec((1, tq, E), lambda n, qi, ki: (n, qi, 0)),    # q
                pl.BlockSpec((1, tk, E), lambda n, qi, ki: (n, ki, 0)),    # k
                pl.BlockSpec((1, tk, E), lambda n, qi, ki: (n, ki, 0)),    # v
                pl.BlockSpec((1, tq, tk), lambda n, qi, ki: (n, qi, ki)),  # mask (int8)
                pl.BlockSpec((E, E), lambda n, qi, ki: (0, 0)),            # fc W^T (bf16, resident)
                pl.BlockSpec((1, E), lambda n, qi, ki: (0, 0)),            # fc bias (resident)
            ],
            out_specs=pl.BlockSpec((1, tq, E), lambda n, qi, ki: (n, qi, 0)),
            scratch_shapes=[
                pltpu.VMEM((tq, heads), jnp.float32),   # running max (heads on lanes)
                pltpu.VMEM((tq, heads), jnp.float32),   # running sum
                pltpu.VMEM((tq, E), jnp.float32),       # context accumulator
            ],
        ),
        compiler_params=pltpu.CompilerParams(
            dimension_semantics=("parallel", "parallel", "arbitrary"),
            vmem_limit_bytes=_vmem_limit_bytes(),
        ),
    )(query, keys, values, mask, fc_w_t, fc_b_2d)

    return out


# ---------------------------------------------------------------------------
# Pure-JAX reference (for correctness check)
# ---------------------------------------------------------------------------
def _reference(values, keys, query, mask, fc_w, fc_b, *, heads):
    N, Lv, E = values.shape
    Lk, Lq = keys.shape[1], query.shape[1]
    D = E // heads
    v = values.reshape(N, Lv, heads, D)
    k = keys.reshape(N, Lk, heads, D)
    q = query.reshape(N, Lq, heads, D)
    energy = jnp.einsum('nqhd,nkhd->nhqk', q, k)
    energy = jnp.where(mask[:, None, :, :] == 0, -jnp.inf, energy)
    attn = jax.nn.softmax(energy / (E ** 0.5), axis=3)
    out = jnp.einsum('nhql,nlhd->nqhd', attn, v).reshape(N, Lq, E)
    return out @ fc_w.T + fc_b


if __name__ == "__main__":
    # Small shapes consistent with the module.
    N, L, embed_size, heads = 2, 8, 32, 4

    key = jax.random.PRNGKey(0)
    k_v, k_k, k_q, k_w, k_b = jax.random.split(key, 5)

    values = jax.random.normal(k_v, (N, L, embed_size), dtype=jnp.float32)
    keys = jax.random.normal(k_k, (N, L, embed_size), dtype=jnp.float32)
    query = jax.random.normal(k_q, (N, L, embed_size), dtype=jnp.float32)

    # Causal mask (no fully-masked rows), built once as int8 (0 = masked).
    mask = jnp.broadcast_to(
        jnp.tril(jnp.ones((L, L), dtype=jnp.int8))[None], (N, L, L))

    # fc_out parameters (torch Linear layout: weight [out, in]).
    fc_w = jax.random.normal(k_w, (embed_size, embed_size), dtype=jnp.float32) * 0.1
    fc_b = jax.random.normal(k_b, (embed_size,), dtype=jnp.float32) * 0.1

    # One-time prep (transpose + bf16 cast) outside the per-call path.
    fc_w_t, fc_b_2d = prepare_params(fc_w, fc_b)

    out = self_attention_forward(values, keys, query, mask, fc_w_t, fc_b_2d,
                                 heads=heads)
    out = jax.block_until_ready(out)

    ref = _reference(values, keys, query, mask, fc_w, fc_b, heads=heads)
    assert out.shape == (N, L, embed_size)
    # bf16 MXU operands + approx reciprocal => looser tolerance vs f32 reference.
    err = float(jnp.max(jnp.abs(out - ref)))
    assert jnp.allclose(out, ref, atol=5e-2, rtol=5e-2), f"max abs err = {err}"

    print("KERNEL_OK")
</pallas_src>

<mosaic_0001>
module attributes {stable_mosaic.version = 11 : i64} {
  func.func @_flash_attn_fc_kernel(%arg0: i32, %arg1: i32, %arg2: i32, %arg3: memref<1x8x32xf32, #tpu.memory_space<vmem>>, %arg4: memref<1x8x32xf32, #tpu.memory_space<vmem>>, %arg5: memref<1x8x32xf32, #tpu.memory_space<vmem>>, %arg6: memref<1x8x8xi8, #tpu.memory_space<vmem>>, %arg7: memref<32x32xbf16, #tpu.memory_space<vmem>>, %arg8: memref<1x32xf32, #tpu.memory_space<vmem>>, %arg9: memref<1x8x32xf32, #tpu.memory_space<vmem>>, %arg10: memref<8x4xf32, #tpu.memory_space<vmem>>, %arg11: memref<8x4xf32, #tpu.memory_space<vmem>>, %arg12: memref<8x32xf32, #tpu.memory_space<vmem>>) attributes {dimension_semantics = [#tpu.dimension_semantics<parallel>, #tpu.dimension_semantics<parallel>, #tpu.dimension_semantics<arbitrary>], iteration_bounds = array<i64: 2, 1, 1>, scalar_prefetch = 0 : i64, scratch_operands = 3 : i64, tpu.core_type = #tpu.core_type<tc>, window_params = [{transform_indices = @transform_0, window_bounds = array<i64: 1, 8, 32>}, {transform_indices = @transform_1, window_bounds = array<i64: 1, 8, 32>}, {transform_indices = @transform_2, window_bounds = array<i64: 1, 8, 32>}, {transform_indices = @transform_3, window_bounds = array<i64: 1, 8, 8>}, {pipeline_mode = #tpu.pipeline_mode<synchronous>, transform_indices = @transform_4, window_bounds = array<i64: 32, 32>}, {pipeline_mode = #tpu.pipeline_mode<synchronous>, transform_indices = @transform_5, window_bounds = array<i64: 1, 32>}, {transform_indices = @transform_6, window_bounds = array<i64: 1, 8, 32>}]} {
    %c0_i32 = arith.constant 0 : i32
    %0 = arith.cmpi eq, %arg2, %c0_i32 : i32
    %1 = arith.extui %0 : i1 to i32
    %c0_i32_0 = arith.constant 0 : i32
    %2 = arith.cmpi ne, %1, %c0_i32_0 : i32
    scf.if %2 {
      %cst_75 = arith.constant -1.000000e+30 : f32
      %137 = vector.broadcast %cst_75 : f32 to vector<8x4xf32>
      %c0_76 = arith.constant 0 : index
      %c0_77 = arith.constant 0 : index
      %138 = vector.load %arg10[%c0_76, %c0_77] : memref<8x4xf32, #tpu.memory_space<vmem>>, vector<8x4xf32>
      tpu.vector_store %arg10[%c0_76, %c0_77], %137 {strides = array<i32>} : memref<8x4xf32, #tpu.memory_space<vmem>>, vector<8x4xf32>,
      %cst_78 = arith.constant 0.000000e+00 : f32
      %139 = vector.broadcast %cst_78 : f32 to vector<8x4xf32>
      %c0_79 = arith.constant 0 : index
      %c0_80 = arith.constant 0 : index
      %140 = vector.load %arg11[%c0_79, %c0_80] : memref<8x4xf32, #tpu.memory_space<vmem>>, vector<8x4xf32>
      tpu.vector_store %arg11[%c0_79, %c0_80], %139 {strides = array<i32>} : memref<8x4xf32, #tpu.memory_space<vmem>>, vector<8x4xf32>,
      %cst_81 = arith.constant 0.000000e+00 : f32
      %141 = vector.broadcast %cst_81 : f32 to vector<8x32xf32>
      %c0_82 = arith.constant 0 : index
      %c0_83 = arith.constant 0 : index
      %142 = vector.load %arg12[%c0_82, %c0_83] : memref<8x32xf32, #tpu.memory_space<vmem>>, vector<8x32xf32>
      tpu.vector_store %arg12[%c0_82, %c0_83], %141 {strides = array<i32>} : memref<8x32xf32, #tpu.memory_space<vmem>>, vector<8x32xf32>,
    } else {
    }
    %c0 = arith.constant 0 : index
    %c0_1 = arith.constant 0 : index
    %c0_2 = arith.constant 0 : index
    %3 = vector.load %arg3[%c0, %c0_1, %c0_2] : memref<1x8x32xf32, #tpu.memory_space<vmem>>, vector<1x8x32xf32>
    %4 = vector.shape_cast %3 : vector<1x8x32xf32> to vector<8x32xf32>
    %cst = arith.constant 0.176776692 : f32
    %5 = vector.broadcast %cst : f32 to vector<8x32xf32>
    %6 = arith.mulf %4, %5 : vector<8x32xf32>
    %7 = arith.truncf %6 : vector<8x32xf32> to vector<8x32xbf16>
    %c0_3 = arith.constant 0 : index
    %c0_4 = arith.constant 0 : index
    %c0_5 = arith.constant 0 : index
    %8 = vector.load %arg4[%c0_3, %c0_4, %c0_5] : memref<1x8x32xf32, #tpu.memory_space<vmem>>, vector<1x8x32xf32>
    %9 = vector.shape_cast %8 : vector<1x8x32xf32> to vector<8x32xf32>
    %10 = arith.truncf %9 : vector<8x32xf32> to vector<8x32xbf16>
    %c0_6 = arith.constant 0 : index
    %c0_7 = arith.constant 0 : index
    %c0_8 = arith.constant 0 : index
    %11 = vector.load %arg5[%c0_6, %c0_7, %c0_8] : memref<1x8x32xf32, #tpu.memory_space<vmem>>, vector<1x8x32xf32>
    %12 = vector.shape_cast %11 : vector<1x8x32xf32> to vector<8x32xf32>
    %13 = arith.truncf %12 : vector<8x32xf32> to vector<8x32xbf16>
    %c0_9 = arith.constant 0 : index
    %c0_10 = arith.constant 0 : index
    %c0_11 = arith.constant 0 : index
    %14 = vector.load %arg6[%c0_9, %c0_10, %c0_11] : memref<1x8x8xi8, #tpu.memory_space<vmem>>, vector<1x8x8xi8>
    %15 = vector.shape_cast %14 : vector<1x8x8xi8> to vector<8x8xi8>
    %16 = arith.sitofp %15 : vector<8x8xi8> to vector<8x8xf32>
    %cst_12 = arith.constant 0.000000e+00 : f32
    %17 = vector.broadcast %cst_12 : f32 to vector<8x8xf32>
    %18 = arith.cmpf oeq, %16, %17 : vector<8x8xf32>
    %cst_13 = arith.constant -1.000000e+30 : f32
    %cst_14 = arith.constant 0.000000e+00 : f32
    %19 = vector.broadcast %cst_13 : f32 to vector<8x8xf32>
    %20 = vector.broadcast %cst_14 : f32 to vector<8x8xf32>
    %21 = arith.select %18, %19, %20 : vector<8x8xi1>, vector<8x8xf32>
    %22 = vector.extract_strided_slice %7 {offsets = [0, 0], sizes = [8, 8], strides = [1, 1]} : vector<8x32xbf16> to vector<8x8xbf16>
    %23 = vector.extract_strided_slice %10 {offsets = [0, 0], sizes = [8, 8], strides = [1, 1]} : vector<8x32xbf16> to vector<8x8xbf16>
    %cst_15 = arith.constant dense<0.000000e+00> : vector<8x8xf32>
    %24 = tpu.matmul %22, %23, %cst_15 {dimension_numbers = #tpu.dot_dimension_numbers<[1], [1], [0], [0], [0, 0, 1, 0], [], []>} : vector<8x8xbf16>, vector<8x8xbf16>, vector<8x8xf32> -> vector<8x8xf32>
    %25 = arith.addf %24, %21 : vector<8x8xf32>
    %c0_16 = arith.constant 0 : index
    %c0_17 = arith.constant 0 : index
    %26 = vector.load %arg10[%c0_16, %c0_17] : memref<8x4xf32, #tpu.memory_space<vmem>>, vector<8x1xf32>
    %c0_18 = arith.constant 0 : index
    %c0_19 = arith.constant 0 : index
    %27 = vector.load %arg11[%c0_18, %c0_19] : memref<8x4xf32, #tpu.memory_space<vmem>>, vector<8x1xf32>
    %cst_20 = arith.constant dense<0xFF800000> : vector<8xf32>
    %28 = vector.multi_reduction <maximumf>, %25, %cst_20 [1] : vector<8x8xf32> to vector<8xf32>
    %29 = vector.shape_cast %28 : vector<8xf32> to vector<8x1xf32>
    %30 = arith.maximumf %26, %29 : vector<8x1xf32>
    %31 = arith.subf %26, %30 : vector<8x1xf32>
    %32 = math.exp %31 : vector<8x1xf32>
    %33 = vector.broadcast %30 : vector<8x1xf32> to vector<8x8xf32>
    %34 = arith.subf %25, %33 : vector<8x8xf32>
    %35 = math.exp %34 : vector<8x8xf32>
    %36 = arith.mulf %32, %27 : vector<8x1xf32>
    %cst_21 = arith.constant dense<0.000000e+00> : vector<8xf32>
    %37 = vector.multi_reduction <add>, %35, %cst_21 [1] : vector<8x8xf32> to vector<8xf32>
    %38 = vector.shape_cast %37 : vector<8xf32> to vector<8x1xf32>
    %39 = arith.addf %36, %38 : vector<8x1xf32>
    %c0_22 = arith.constant 0 : index
    %c0_23 = arith.constant 0 : index
    %40 = vector.load %arg11[%c0_22, %c0_23] : memref<8x4xf32, #tpu.memory_space<vmem>>, vector<8x1xf32>
    tpu.vector_store %arg11[%c0_22, %c0_23], %39 {strides = array<i32>} : memref<8x4xf32, #tpu.memory_space<vmem>>, vector<8x1xf32>,
    %c0_24 = arith.constant 0 : index
    %c0_25 = arith.constant 0 : index
    %41 = vector.load %arg10[%c0_24, %c0_25] : memref<8x4xf32, #tpu.memory_space<vmem>>, vector<8x1xf32>
    tpu.vector_store %arg10[%c0_24, %c0_25], %30 {strides = array<i32>} : memref<8x4xf32, #tpu.memory_space<vmem>>, vector<8x1xf32>,
    %c0_26 = arith.constant 0 : index
    %c0_27 = arith.constant 0 : index
    %42 = vector.load %arg12[%c0_26, %c0_27] : memref<8x32xf32, #tpu.memory_space<vmem>>, vector<8x8xf32>
    %43 = vector.broadcast %32 : vector<8x1xf32> to vector<8x8xf32>
    %44 = arith.mulf %43, %42 : vector<8x8xf32>
    %45 = arith.truncf %35 : vector<8x8xf32> to vector<8x8xbf16>
    %46 = vector.extract_strided_slice %13 {offsets = [0, 0], sizes = [8, 8], strides = [1, 1]} : vector<8x32xbf16> to vector<8x8xbf16>
    %cst_28 = arith.constant dense<0.000000e+00> : vector<8x8xf32>
    %47 = tpu.matmul %45, %46, %cst_28 {dimension_numbers = #tpu.dot_dimension_numbers<[1], [0], [0], [1], [0, 0, 1, 1], [], []>} : vector<8x8xbf16>, vector<8x8xbf16>, vector<8x8xf32> -> vector<8x8xf32>
    %48 = arith.addf %44, %47 : vector<8x8xf32>
    %c0_29 = arith.constant 0 : index
    %c0_30 = arith.constant 0 : index
    %49 = vector.load %arg12[%c0_29, %c0_30] : memref<8x32xf32, #tpu.memory_space<vmem>>, vector<8x8xf32>
    tpu.vector_store %arg12[%c0_29, %c0_30], %48 {strides = array<i32>} : memref<8x32xf32, #tpu.memory_space<vmem>>, vector<8x8xf32>,
    %50 = vector.extract_strided_slice %7 {offsets = [0, 8], sizes = [8, 8], strides = [1, 1]} : vector<8x32xbf16> to vector<8x8xbf16>
    %51 = vector.extract_strided_slice %10 {offsets = [0, 8], sizes = [8, 8], strides = [1, 1]} : vector<8x32xbf16> to vector<8x8xbf16>
    %cst_31 = arith.constant dense<0.000000e+00> : vector<8x8xf32>
    %52 = tpu.matmul %50, %51, %cst_31 {dimension_numbers = #tpu.dot_dimension_numbers<[1], [1], [0], [0], [0, 0, 1, 0], [], []>} : vector<8x8xbf16>, vector<8x8xbf16>, vector<8x8xf32> -> vector<8x8xf32>
    %53 = arith.addf %52, %21 : vector<8x8xf32>
    %c0_32 = arith.constant 0 : index
    %c1 = arith.constant 1 : index
    %54 = vector.load %arg10[%c0_32, %c1] : memref<8x4xf32, #tpu.memory_space<vmem>>, vector<8x1xf32>
    %c0_33 = arith.constant 0 : index
    %c1_34 = arith.constant 1 : index
    %55 = vector.load %arg11[%c0_33, %c1_34] : memref<8x4xf32, #tpu.memory_space<vmem>>, vector<8x1xf32>
    %cst_35 = arith.constant dense<0xFF800000> : vector<8xf32>
    %56 = vector.multi_reduction <maximumf>, %53, %cst_35 [1] : vector<8x8xf32> to vector<8xf32>
    %57 = vector.shape_cast %56 : vector<8xf32> to vector<8x1xf32>
    %58 = arith.maximumf %54, %57 : vector<8x1xf32>
    %59 = arith.subf %54, %58 : vector<8x1xf32>
    %60 = math.exp %59 : vector<8x1xf32>
    %61 = vector.broadcast %58 : vector<8x1xf32> to vector<8x8xf32>
    %62 = arith.subf %53, %61 : vector<8x8xf32>
    %63 = math.exp %62 : vector<8x8xf32>
    %64 = arith.mulf %60, %55 : vector<8x1xf32>
    %cst_36 = arith.constant dense<0.000000e+00> : vector<8xf32>
    %65 = vector.multi_reduction <add>, %63, %cst_36 [1] : vector<8x8xf32> to vector<8xf32>
    %66 = vector.shape_cast %65 : vector<8xf32> to vector<8x1xf32>
    %67 = arith.addf %64, %66 : vector<8x1xf32>
    %c0_37 = arith.constant 0 : index
    %c1_38 = arith.constant 1 : index
    %68 = vector.load %arg11[%c0_37, %c1_38] : memref<8x4xf32, #tpu.memory_space<vmem>>, vector<8x1xf32>
    tpu.vector_store %arg11[%c0_37, %c1_38], %67 {strides = array<i32>} : memref<8x4xf32, #tpu.memory_space<vmem>>, vector<8x1xf32>,
    %c0_39 = arith.constant 0 : index
    %c1_40 = arith.constant 1 : index
    %69 = vector.load %arg10[%c0_39, %c1_40] : memref<8x4xf32, #tpu.memory_space<vmem>>, vector<8x1xf32>
    tpu.vector_store %arg10[%c0_39, %c1_40], %58 {strides = array<i32>} : memref<8x4xf32, #tpu.memory_space<vmem>>, vector<8x1xf32>,
    %c0_41 = arith.constant 0 : index
    %c8 = arith.constant 8 : index
    %70 = vector.load %arg12[%c0_41, %c8] : memref<8x32xf32, #tpu.memory_space<vmem>>, vector<8x8xf32>
    %71 = vector.broadcast %60 : vector<8x1xf32> to vector<8x8xf32>
    %72 = arith.mulf %71, %70 : vector<8x8xf32>
    %73 = arith.truncf %63 : vector<8x8xf32> to vector<8x8xbf16>
    %74 = vector.extract_strided_slice %13 {offsets = [0, 8], sizes = [8, 8], strides = [1, 1]} : vector<8x32xbf16> to vector<8x8xbf16>
    %cst_42 = arith.constant dense<0.000000e+00> : vector<8x8xf32>
    %75 = tpu.matmul %73, %74, %cst_42 {dimension_numbers = #tpu.dot_dimension_numbers<[1], [0], [0], [1], [0, 0, 1, 1], [], []>} : vector<8x8xbf16>, vector<8x8xbf16>, vector<8x8xf32> -> vector<8x8xf32>
    %76 = arith.addf %72, %75 : vector<8x8xf32>
    %c0_43 = arith.constant 0 : index
    %c8_44 = arith.constant 8 : index
    %77 = vector.load %arg12[%c0_43, %c8_44] : memref<8x32xf32, #tpu.memory_space<vmem>>, vector<8x8xf32>
    tpu.vector_store %arg12[%c0_43, %c8_44], %76 {strides = array<i32>} : memref<8x32xf32, #tpu.memory_space<vmem>>, vector<8x8xf32>,
    %78 = vector.extract_strided_slice %7 {offsets = [0, 16], sizes = [8, 8], strides = [1, 1]} : vector<8x32xbf16> to vector<8x8xbf16>
    %79 = vector.extract_strided_slice %10 {offsets = [0, 16], sizes = [8, 8], strides = [1, 1]} : vector<8x32xbf16> to vector<8x8xbf16>
    %cst_45 = arith.constant dense<0.000000e+00> : vector<8x8xf32>
    %80 = tpu.matmul %78, %79, %cst_45 {dimension_numbers = #tpu.dot_dimension_numbers<[1], [1], [0], [0], [0, 0, 1, 0], [], []>} : vector<8x8xbf16>, vector<8x8xbf16>, vector<8x8xf32> -> vector<8x8xf32>
    %81 = arith.addf %80, %21 : vector<8x8xf32>
    %c0_46 = arith.constant 0 : index
    %c2 = arith.constant 2 : index
    %82 = vector.load %arg10[%c0_46, %c2] : memref<8x4xf32, #tpu.memory_space<vmem>>, vector<8x1xf32>
    %c0_47 = arith.constant 0 : index
    %c2_48 = arith.constant 2 : index
    %83 = vector.load %arg11[%c0_47, %c2_48] : memref<8x4xf32, #tpu.memory_space<vmem>>, vector<8x1xf32>
    %cst_49 = arith.constant dense<0xFF800000> : vector<8xf32>
    %84 = vector.multi_reduction <maximumf>, %81, %cst_49 [1] : vector<8x8xf32> to vector<8xf32>
    %85 = vector.shape_cast %84 : vector<8xf32> to vector<8x1xf32>
    %86 = arith.maximumf %82, %85 : vector<8x1xf32>
    %87 = arith.subf %82, %86 : vector<8x1xf32>
    %88 = math.exp %87 : vector<8x1xf32>
    %89 = vector.broadcast %86 : vector<8x1xf32> to vector<8x8xf32>
    %90 = arith.subf %81, %89 : vector<8x8xf32>
    %91 = math.exp %90 : vector<8x8xf32>
    %92 = arith.mulf %88, %83 : vector<8x1xf32>
    %cst_50 = arith.constant dense<0.000000e+00> : vector<8xf32>
    %93 = vector.multi_reduction <add>, %91, %cst_50 [1] : vector<8x8xf32> to vector<8xf32>
    %94 = vector.shape_cast %93 : vector<8xf32> to vector<8x1xf32>
    %95 = arith.addf %92, %94 : vector<8x1xf32>
    %c0_51 = arith.constant 0 : index
    %c2_52 = arith.constant 2 : index
    %96 = vector.load %arg11[%c0_51, %c2_52] : memref<8x4xf32, #tpu.memory_space<vmem>>, vector<8x1xf32>
    tpu.vector_store %arg11[%c0_51, %c2_52], %95 {strides = array<i32>} : memref<8x4xf32, #tpu.memory_space<vmem>>, vector<8x1xf32>,
    %c0_53 = arith.constant 0 : index
    %c2_54 = arith.constant 2 : index
    %97 = vector.load %arg10[%c0_53, %c2_54] : memref<8x4xf32, #tpu.memory_space<vmem>>, vector<8x1xf32>
    tpu.vector_store %arg10[%c0_53, %c2_54], %86 {strides = array<i32>} : memref<8x4xf32, #tpu.memory_space<vmem>>, vector<8x1xf32>,
    %c0_55 = arith.constant 0 : index
    %c16 = arith.constant 16 : index
    %98 = vector.load %arg12[%c0_55, %c16] : memref<8x32xf32, #tpu.memory_space<vmem>>, vector<8x8xf32>
    %99 = vector.broadcast %88 : vector<8x1xf32> to vector<8x8xf32>
    %100 = arith.mulf %99, %98 : vector<8x8xf32>
    %101 = arith.truncf %91 : vector<8x8xf32> to vector<8x8xbf16>
    %102 = vector.extract_strided_slice %13 {offsets = [0, 16], sizes = [8, 8], strides = [1, 1]} : vector<8x32xbf16> to vector<8x8xbf16>
    %cst_56 = arith.constant dense<0.000000e+00> : vector<8x8xf32>
    %103 = tpu.matmul %101, %102, %cst_56 {dimension_numbers = #tpu.dot_dimension_numbers<[1], [0], [0], [1], [0, 0, 1, 1], [], []>} : vector<8x8xbf16>, vector<8x8xbf16>, vector<8x8xf32> -> vector<8x8xf32>
    %104 = arith.addf %100, %103 : vector<8x8xf32>
    %c0_57 = arith.constant 0 : index
    %c16_58 = arith.constant 16 : index
    %105 = vector.load %arg12[%c0_57, %c16_58] : memref<8x32xf32, #tpu.memory_space<vmem>>, vector<8x8xf32>
    tpu.vector_store %arg12[%c0_57, %c16_58], %104 {strides = array<i32>} : memref<8x32xf32, #tpu.memory_space<vmem>>, vector<8x8xf32>,
    %106 = vector.extract_strided_slice %7 {offsets = [0, 24], sizes = [8, 8], strides = [1, 1]} : vector<8x32xbf16> to vector<8x8xbf16>
    %107 = vector.extract_strided_slice %10 {offsets = [0, 24], sizes = [8, 8], strides = [1, 1]} : vector<8x32xbf16> to vector<8x8xbf16>
    %cst_59 = arith.constant dense<0.000000e+00> : vector<8x8xf32>
    %108 = tpu.matmul %106, %107, %cst_59 {dimension_numbers = #tpu.dot_dimension_numbers<[1], [1], [0], [0], [0, 0, 1, 0], [], []>} : vector<8x8xbf16>, vector<8x8xbf16>, vector<8x8xf32> -> vector<8x8xf32>
    %109 = arith.addf %108, %21 : vector<8x8xf32>
    %c0_60 = arith.constant 0 : index
    %c3 = arith.constant 3 : index
    %110 = vector.load %arg10[%c0_60, %c3] : memref<8x4xf32, #tpu.memory_space<vmem>>, vector<8x1xf32>
    %c0_61 = arith.constant 0 : index
    %c3_62 = arith.constant 3 : index
    %111 = vector.load %arg11[%c0_61, %c3_62] : memref<8x4xf32, #tpu.memory_space<vmem>>, vector<8x1xf32>
    %cst_63 = arith.constant dense<0xFF800000> : vector<8xf32>
    %112 = vector.multi_reduction <maximumf>, %109, %cst_63 [1] : vector<8x8xf32> to vector<8xf32>
    %113 = vector.shape_cast %112 : vector<8xf32> to vector<8x1xf32>
    %114 = arith.maximumf %110, %113 : vector<8x1xf32>
    %115 = arith.subf %110, %114 : vector<8x1xf32>
    %116 = math.exp %115 : vector<8x1xf32>
    %117 = vector.broadcast %114 : vector<8x1xf32> to vector<8x8xf32>
    %118 = arith.subf %109, %117 : vector<8x8xf32>
    %119 = math.exp %118 : vector<8x8xf32>
    %120 = arith.mulf %116, %111 : vector<8x1xf32>
    %cst_64 = arith.constant dense<0.000000e+00> : vector<8xf32>
    %121 = vector.multi_reduction <add>, %119, %cst_64 [1] : vector<8x8xf32> to vector<8xf32>
    %122 = vector.shape_cast %121 : vector<8xf32> to vector<8x1xf32>
    %123 = arith.addf %120, %122 : vector<8x1xf32>
    %c0_65 = arith.constant 0 : index
    %c3_66 = arith.constant 3 : index
    %124 = vector.load %arg11[%c0_65, %c3_66] : memref<8x4xf32, #tpu.memory_space<vmem>>, vector<8x1xf32>
    tpu.vector_store %arg11[%c0_65, %c3_66], %123 {strides = array<i32>} : memref<8x4xf32, #tpu.memory_space<vmem>>, vector<8x1xf32>,
    %c0_67 = arith.constant 0 : index
    %c3_68 = arith.constant 3 : index
    %125 = vector.load %arg10[%c0_67, %c3_68] : memref<8x4xf32, #tpu.memory_space<vmem>>, vector<8x1xf32>
    tpu.vector_store %arg10[%c0_67, %c3_68], %114 {strides = array<i32>} : memref<8x4xf32, #tpu.memory_space<vmem>>, vector<8x1xf32>,
    %c0_69 = arith.constant 0 : index
    %c24 = arith.constant 24 : index
    %126 = vector.load %arg12[%c0_69, %c24] : memref<8x32xf32, #tpu.memory_space<vmem>>, vector<8x8xf32>
    %127 = vector.broadcast %116 : vector<8x1xf32> to vector<8x8xf32>
    %128 = arith.mulf %127, %126 : vector<8x8xf32>
    %129 = arith.truncf %119 : vector<8x8xf32> to vector<8x8xbf16>
    %130 = vector.extract_strided_slice %13 {offsets = [0, 24], sizes = [8, 8], strides = [1, 1]} : vector<8x32xbf16> to vector<8x8xbf16>
    %cst_70 = arith.constant dense<0.000000e+00> : vector<8x8xf32>
    %131 = tpu.matmul %129, %130, %cst_70 {dimension_numbers = #tpu.dot_dimension_numbers<[1], [0], [0], [1], [0, 0, 1, 1], [], []>} : vector<8x8xbf16>, vector<8x8xbf16>, vector<8x8xf32> -> vector<8x8xf32>
    %132 = arith.addf %128, %131 : vector<8x8xf32>
    %c0_71 = arith.constant 0 : index
    %c24_72 = arith.constant 24 : index
    %133 = vector.load %arg12[%c0_71, %c24_72] : memref<8x32xf32, #tpu.memory_space<vmem>>, vector<8x8xf32>
    tpu.vector_store %arg12[%c0_71, %c24_72], %132 {strides = array<i32>} : memref<8x32xf32, #tpu.memory_space<vmem>>, vector<8x8xf32>,
    %c0_i32_73 = arith.constant 0 : i32
    %134 = arith.cmpi eq, %arg2, %c0_i32_73 : i32
    %135 = arith.extui %134 : i1 to i32
    %c0_i32_74 = arith.constant 0 : i32
    %136 = arith.cmpi ne, %135, %c0_i32_74 : i32
    scf.if %136 {
      %c0_75 = arith.constant 0 : index
      %c0_76 = arith.constant 0 : index
      %137 = vector.load %arg11[%c0_75, %c0_76] : memref<8x4xf32, #tpu.memory_space<vmem>>, vector<8x1xf32>
      %138 = tpu.reciprocal %137 {approx = true} : vector<8x1xf32> -> vector<8x1xf32>
      %c0_77 = arith.constant 0 : index
      %c0_78 = arith.constant 0 : index
      %139 = vector.load %arg12[%c0_77, %c0_78] : memref<8x32xf32, #tpu.memory_space<vmem>>, vector<8x8xf32>
      %140 = vector.broadcast %138 : vector<8x1xf32> to vector<8x8xf32>
      %141 = arith.mulf %139, %140 : vector<8x8xf32>
      %c0_79 = arith.constant 0 : index
      %c0_80 = arith.constant 0 : index
      %142 = vector.load %arg12[%c0_79, %c0_80] : memref<8x32xf32, #tpu.memory_space<vmem>>, vector<8x8xf32>
      tpu.vector_store %arg12[%c0_79, %c0_80], %141 {strides = array<i32>} : memref<8x32xf32, #tpu.memory_space<vmem>>, vector<8x8xf32>,
      %c0_81 = arith.constant 0 : index
      %c1_82 = arith.constant 1 : index
      %143 = vector.load %arg11[%c0_81, %c1_82] : memref<8x4xf32, #tpu.memory_space<vmem>>, vector<8x1xf32>
      %144 = tpu.reciprocal %143 {approx = true} : vector<8x1xf32> -> vector<8x1xf32>
      %c0_83 = arith.constant 0 : index
      %c8_84 = arith.constant 8 : index
      %145 = vector.load %arg12[%c0_83, %c8_84] : memref<8x32xf32, #tpu.memory_space<vmem>>, vector<8x8xf32>
      %146 = vector.broadcast %144 : vector<8x1xf32> to vector<8x8xf32>
      %147 = arith.mulf %145, %146 : vector<8x8xf32>
      %c0_85 = arith.constant 0 : index
      %c8_86 = arith.constant 8 : index
      %148 = vector.load %arg12[%c0_85, %c8_86] : memref<8x32xf32, #tpu.memory_space<vmem>>, vector<8x8xf32>
      tpu.vector_store %arg12[%c0_85, %c8_86], %147 {strides = array<i32>} : memref<8x32xf32, #tpu.memory_space<vmem>>, vector<8x8xf32>,
      %c0_87 = arith.constant 0 : index
      %c2_88 = arith.constant 2 : index
      %149 = vector.load %arg11[%c0_87, %c2_88] : memref<8x4xf32, #tpu.memory_space<vmem>>, vector<8x1xf32>
      %150 = tpu.reciprocal %149 {approx = true} : vector<8x1xf32> -> vector<8x1xf32>
      %c0_89 = arith.constant 0 : index
      %c16_90 = arith.constant 16 : index
      %151 = vector.load %arg12[%c0_89, %c16_90] : memref<8x32xf32, #tpu.memory_space<vmem>>, vector<8x8xf32>
      %152 = vector.broadcast %150 : vector<8x1xf32> to vector<8x8xf32>
      %153 = arith.mulf %151, %152 : vector<8x8xf32>
      %c0_91 = arith.constant 0 : index
      %c16_92 = arith.constant 16 : index
      %154 = vector.load %arg12[%c0_91, %c16_92] : memref<8x32xf32, #tpu.memory_space<vmem>>, vector<8x8xf32>
      tpu.vector_store %arg12[%c0_91, %c16_92], %153 {strides = array<i32>} : memref<8x32xf32, #tpu.memory_space<vmem>>, vector<8x8xf32>,
      %c0_93 = arith.constant 0 : index
      %c3_94 = arith.constant 3 : index
      %155 = vector.load %arg11[%c0_93, %c3_94] : memref<8x4xf32, #tpu.memory_space<vmem>>, vector<8x1xf32>
      %156 = tpu.reciprocal %155 {approx = true} : vector<8x1xf32> -> vector<8x1xf32>
      %c0_95 = arith.constant 0 : index
      %c24_96 = arith.constant 24 : index
      %157 = vector.load %arg12[%c0_95, %c24_96] : memref<8x32xf32, #tpu.memory_space<vmem>>, vector<8x8xf32>
      %158 = vector.broadcast %156 : vector<8x1xf32> to vector<8x8xf32>
      %159 = arith.mulf %157, %158 : vector<8x8xf32>
      %c0_97 = arith.constant 0 : index
      %c24_98 = arith.constant 24 : index
      %160 = vector.load %arg12[%c0_97, %c24_98] : memref<8x32xf32, #tpu.memory_space<vmem>>, vector<8x8xf32>
      tpu.vector_store %arg12[%c0_97, %c24_98], %159 {strides = array<i32>} : memref<8x32xf32, #tpu.memory_space<vmem>>, vector<8x8xf32>,
      %c0_99 = arith.constant 0 : index
      %c0_100 = arith.constant 0 : index
      %161 = vector.load %arg12[%c0_99, %c0_100] : memref<8x32xf32, #tpu.memory_space<vmem>>, vector<8x32xf32>
      %162 = arith.truncf %161 : vector<8x32xf32> to vector<8x32xbf16>
      %c0_101 = arith.constant 0 : index
      %c0_102 = arith.constant 0 : index
      %163 = vector.load %arg7[%c0_101, %c0_102] : memref<32x32xbf16, #tpu.memory_space<vmem>>, vector<32x32xbf16>
      %cst_103 = arith.constant dense<0.000000e+00> : vector<8x32xf32>
      %164 = tpu.matmul %162, %163, %cst_103 {dimension_numbers = #tpu.dot_dimension_numbers<[1], [0], [0], [1], [0, 0, 1, 1], [], []>} : vector<8x32xbf16>, vector<32x32xbf16>, vector<8x32xf32> -> vector<8x32xf32>
      %c0_104 = arith.constant 0 : index
      %c0_105 = arith.constant 0 : index
      %165 = vector.load %arg8[%c0_104, %c0_105] : memref<1x32xf32, #tpu.memory_space<vmem>>, vector<1x32xf32>
      %166 = vector.broadcast %165 : vector<1x32xf32> to vector<8x32xf32>
      %167 = arith.addf %164, %166 : vector<8x32xf32>
      %c0_106 = arith.constant 0 : index
      %c0_107 = arith.constant 0 : index
      %c0_108 = arith.constant 0 : index
      %168 = vector.load %arg9[%c0_106, %c0_107, %c0_108] : memref<1x8x32xf32, #tpu.memory_space<vmem>>, vector<1x8x32xf32>
      %169 = vector.shape_cast %168 : vector<1x8x32xf32> to vector<8x32xf32>
      %170 = vector.shape_cast %167 : vector<8x32xf32> to vector<1x8x32xf32>
      tpu.vector_store %arg9[%c0_106, %c0_107, %c0_108], %170 {strides = array<i32>} : memref<1x8x32xf32, #tpu.memory_space<vmem>>, vector<1x8x32xf32>,
    } else {
    }
    return
  }
  func.func @transform_0(%arg0: i32, %arg1: i32, %arg2: i32) -> (i32, i32, i32) {
    %c0_i32 = arith.constant 0 : i32
    %c0_i32_0 = arith.constant 0 : i32
    return %arg0, %arg1, %c0_i32 : i32, i32, i32
  }
  func.func @transform_1(%arg0: i32, %arg1: i32, %arg2: i32) -> (i32, i32, i32) {
    %c0_i32 = arith.constant 0 : i32
    %c0_i32_0 = arith.constant 0 : i32
    return %arg0, %arg2, %c0_i32 : i32, i32, i32
  }
  func.func @transform_2(%arg0: i32, %arg1: i32, %arg2: i32) -> (i32, i32, i32) {
    %c0_i32 = arith.constant 0 : i32
    %c0_i32_0 = arith.constant 0 : i32
    return %arg0, %arg2, %c0_i32 : i32, i32, i32
  }
  func.func @transform_3(%arg0: i32, %arg1: i32, %arg2: i32) -> (i32, i32, i32) {
    %c0_i32 = arith.constant 0 : i32
    return %arg0, %arg1, %arg2 : i32, i32, i32
  }
  func.func @transform_4(%arg0: i32, %arg1: i32, %arg2: i32) -> (i32, i32) {
    %c0_i32 = arith.constant 0 : i32
    %c0_i32_0 = arith.constant 0 : i32
    %c0_i32_1 = arith.constant 0 : i32
    return %c0_i32, %c0_i32_0 : i32, i32
  }
  func.func @transform_5(%arg0: i32, %arg1: i32, %arg2: i32) -> (i32, i32) {
    %c0_i32 = arith.constant 0 : i32
    %c0_i32_0 = arith.constant 0 : i32
    %c0_i32_1 = arith.constant 0 : i32
    return %c0_i32, %c0_i32_0 : i32, i32
  }
  func.func @transform_6(%arg0: i32, %arg1: i32, %arg2: i32) -> (i32, i32, i32) {
    %c0_i32 = arith.constant 0 : i32
    %c0_i32_0 = arith.constant 0 : i32
    return %arg0, %arg1, %c0_i32 : i32, i32, i32
  }
}

</mosaic_0001>

<bundles_post_ra>
// kernel: tpu_custom_call.1
= control target key start
LH: loop header
LB: loop body
LE: loop exit
PB: predicated region body
PF: predicated region fallthrough
CT: control target
= control target key end

     0   :  { %s2397_s0 = inlined_call_operand.hbm [shape: f32[2,8,32], index: 0, kind: input, shape index: {}]   ;;  %s2398_s1 = inlined_call_operand.hbm [shape: f32[2,8,32], index: 1, kind: input, shape index: {}]   ;;  %s2399_s2 = inlined_call_operand.hbm [shape: f32[2,8,32], index: 2, kind: input, shape index: {}]   ;;  %s2400_s3 = inlined_call_operand.hbm [shape: s8[2,8,8], index: 3, kind: input, shape index: {}]   ;;  %s2401_s4 = inlined_call_operand.hbm [shape: bf16[32,32], index: 4, kind: input, shape index: {}]   ;;  %s2402_s5 = inlined_call_operand.hbm [shape: f32[1,32], index: 5, kind: input, shape index: {}]   ;;  %s2403_s6 = inlined_call_operand.hbm [shape: f32[2,8,32], index: 6, kind: output, shape index: {}]  }
   0x1   :  { %2420 = sst [smem:[#allocation28_spill]] %s2398_s1 }
   0x2   :  { %2421 = sst [smem:[#allocation29_spill]] %s2401_s4 }
   0x3   :  { %11 = vsyncpa [#allocation6], 0 }
   0x4   :  { %13 = vsyncpa [#allocation6 + $0x1], 0 }
   0x5   :  { %14 = vsyncpa [#allocation9], 0 }
   0x6   :  { %16 = vsyncpa [#allocation9 + $0x1], 0 }
   0x7   :  { %17 = vsyncpa [#allocation12], 0 }
   0x8   :  { %19 = vsyncpa [#allocation12 + $0x1], 0 }
   0x9   :  { %20 = vsyncpa [#allocation15], 0 }
   0xa   :  { %21 = vsyncpa [#allocation7], 0 }
   0xb   :  { %23 = vsyncpa [#allocation7 + $0x1], 0  ;;  %s1898_s21 = smov 0   ;;  %s1900_s22 = smov 0  }
   0xc   :  { %s1902_s23 = smov 0   ;;  %s1904_s24 = smov 0  }
   0xd   :  { %s1906_s25 = smov 0   ;;  %s1908_s26 = smov 0  }
   0xe LB: > { %2422 = sst [smem:[#allocation23_spill]] %s1819_s21  ;;  %s1929_s27 = sadd.s32 4294967295, %s1839_s26   ;;  %s1839_s26 = sphi %s1908_s26, %s29_s26   ;;  %s1835_s25 = sphi %s1906_s25, %s2462_s25   ;;  %s1831_s24 = sphi %s1904_s24, %s2461_s24   ;;  %s1827_s23 = sphi %s1902_s23, %s2457_s23   ;;  %s1823_s22 = sphi %s1900_s22, %s2460_s22   ;;  %s1819_s21 = sphi %s1898_s21, %s2459_s21  }
   0xf   : > { %2423 = sst [smem:[#allocation24_spill]] %s1827_s23  ;;  %s1307_s28 = sadd.s32 4294967294, %s1839_s26  }
  0x10   : > { %p70_p0 = scmp.ne.s32.totalorder %s1823_s22, %s1819_s21  ;;  %p2404_p1 = scmp.eq.s32.totalorder %s1929_s27, 0 }
  0x11   : > { %p230_p3 = scmp.eq.s32.totalorder %s1307_s28, 1  ;;  %p1308_p5 = scmp.ge.s32.totalorder %s1839_s26, 1 }
  0x12   : > { %p1938_p4 = por %p2404_p1, %p70_p0  ;;  %p237_p7 = scmp.lt.s32.totalorder %s1839_s26, 3 }
  0x13   : > { %p1943_p6 = por %p230_p3, %p70_p0  ;;  %s1841_s8 = smov [#allocation13]  }
  0x14   : > { %s2424_s29 = scalar_select %p1938_p4, 1, 0 }
  0x15   : > { %s2425_s30 = scalar_select %p1943_p6, 1, 0 }
  0x16   : > { %p1948_p8 = pnand %p1308_p5, %p237_p7  ;;  %s249_s9 = sshll.u32 %s1841_s8, 4  ;;  %s250_s9 = int_to_ptr.vmem [resolvable:$true] %s249_s9 }
  0x17   : > { %2426 = sst [smem:[#allocation25_spill]] %s2425_s30  ;;  %s48_s11 = sadd.s32 1, %s1835_s25 }
  0x18   : > { %s2427_s7 = scalar_select %p1948_p8, 1, 0 }
  0x19   : > { %p1437_p9 = pneg %p1948_p8  ;;  %s2429_s4 = sld [smem:[#allocation29_spill]] }
  0x1b   : > { %p1957_p11 = pnand %p1437_p9, %p2404_p1 }
  0x1d   : > { %s2428_s10 = scalar_select %p1957_p11, 1, 0 }
  0x1e   : > { %p2411_p13 = pneg %p1957_p11 }
  0x1f   : > { %s1565_s14 = scalar_lea.hbm %s2429_s4, 256 }
  0x20   : > { %p1566_p12 = scmp.ne.s32.totalorder %s2429_s4, %s1565_s14  ;;  %p1572_p5 = scmp.lt.u32.totalorder %s1565_s14, %s2429_s4 }
  0x22   : > { %p1568_p0 = pnand %p2411_p13, %p1566_p12 }
  0x24   : > { %p1569_p3 = pneg %p1568_p0 }
  0x26   : > { %p1574_p7 = pnand %p1572_p5, %p1569_p3 }
  0x28   : > { %1577 = shalt.err (!%p1574_p7)
}
  0x29   : > { %s1578_s19 = scalar_lea.vmem %s250_s9, 256  ;;  %p1586_p2 = scmp.lt.s32.totalorder %s250_s9, %s250_s9 }
  0x2a   : > { %p1579_p9 = scmp.ne.s32.totalorder %s250_s9, %s1578_s19  ;;  %p1587_p6 = scmp.lt.s32.totalorder %s1578_s19, %s1578_s19 }
  0x2c   : > { %p1581_p10 = pnand %p1579_p9, %p2411_p13  ;;  %p1588_p4 = por %p1587_p6, %p1586_p2 }
  0x2e   : > { %p1582_p1 = pneg %p1581_p10 }
  0x30   : > { %p1589_p8 = pnand %p1588_p4, %p1582_p1 }
  0x32   : > { %1592 = shalt.err (!%p1589_p8)
}
  0x33   : > { %s1842_s20 = smov 64   ;;  %s1843_s28 = smov 4  }
  0x34   : > { %1440 = dma.hbm_to_vmem [thread:$0]  (!%p1957_p11), %s2429_s4, 256, %s250_s9, [#allocation12], %s1842_s20, %s1842_s20, %s1843_s28  }
  0x35   : > { %p50_p1 = scmp.ge.s32.totalorder %s48_s11, 2  ;;  %s57_s13 = sadd.s32 1, %s1827_s23 }
  0x36   : > { %p64_p2 = scmp.ne.s32.totalorder %s1827_s23, %s1823_s22  ;;  %p65_p4 = scmp.eq.s32.totalorder %s1839_s26, 0 }
  0x37   : > { %s2464_s11 = smov (%p50_p1, %s48_s11), 0  ;;  %p2431_p8 = scmp.eq.s32.totalorder %s1929_s27, 1 }
  0x38   : > { %2430 = sst [smem:[#allocation26_spill]] %s2464_s11  ;;  %p66_p6 = por %p65_p4, %p64_p2 }
  0x39   : > { %p1992_p10 = por %p2431_p8, %p64_p2  ;;  %s52_s15 = ssub.s32 %s1835_s25, %s2464_s11 }
  0x3a   : > { %p1463_p12 = scmp.lt.s32.totalorder %s1839_s26, 2  ;;  %p55_p0 = scmp.eq.s32.totalorder %s52_s15, 0 }
  0x3b   : > { %s2432_s14 = scalar_select %p1992_p10, 1, 0 }
  0x3c   : > { %s2000_s16 = sand.u32 1, %s1827_s23   ;;  %s2006_s17 = sshll.u32 %s1835_s25, 7 }
  0x3d   : > { %s2003_s9 = sshll.u32 %s2000_s16, 3  ;;  %p2011_p3 = pnand %p1463_p12, %p66_p6 }
  0x3e   : > { %s2009_s18 = scalar_select %p55_p0, %s1827_s23, %s57_s13  }
  0x3f   : > { %s2434_s19 = scalar_select %p2011_p3, 1, 0 }
  0x40   : > { %2433 = sst [smem:[#allocation27_spill]] %s2009_s18  ;;  %s2410_s20 = sand.u32 1, %s1839_s26  }
  0x41   : > { %s2435_s1 = sld [smem:[#allocation28_spill]]  ;;  %s297_s15 = scalar_lea.vmem [#allocation8], %s2003_s9 }
  0x42   : > { %s305_s4 = sshll.u32 %s297_s15, 4  ;;  %s2027_s13 = scalar_lea.sflag [#allocation9], %s2410_s20  ;;  %s2023_s4 = int_to_ptr.vmem [resolvable:$true] %s305_s4 }
  0x43   : > { %p2033_p7 = pneg %p2011_p3 }
  0x45   : > { %s2436_s18 = scalar_select %p2033_p7, 1, 0 }
  0x47   : > { %s2020_s12 = scalar_lea.hbm %s2435_s1, %s2006_s17  ;;  %s1598_s15 = scalar_lea.hbm %s2435_s1, 256 }
  0x48   : > { %s1593_s11 = scalar_lea.hbm %s2020_s12, 128  ;;  %p1599_p2 = scmp.lt.u32.totalorder %s2020_s12, %s2435_s1 }
  0x49   : > { %p1594_p5 = scmp.ne.s32.totalorder %s2020_s12, %s1593_s11  ;;  %p1600_p4 = scmp.lt.u32.totalorder %s1598_s15, %s1593_s11 }
  0x4a   : > { %p1602_p8 = scmp.lt.u32.totalorder %s1593_s11, %s2020_s12 }
  0x4b   : > { %p1596_p9 = pnand %p2033_p7, %p1594_p5  ;;  %p1601_p6 = por %p1600_p4, %p1599_p2 }
  0x4d   : > { %p1597_p1 = pneg %p1596_p9  ;;  %p1603_p12 = por %p1602_p8, %p1601_p6 }
  0x4f   : > { %p1604_p0 = pnand %p1603_p12, %p1597_p1 }
  0x51   : > { %1607 = shalt.err (!%p1604_p0)
}
  0x52   : > { %s1608_s20 = scalar_lea.vmem %s2023_s4, 128  ;;  %s1844_s28 = smov [#allocation8]  }
  0x53   : > { %p1609_p5 = scmp.ne.s32.totalorder %s2023_s4, %s1608_s20  ;;  %s1613_s8 = sshll.u32 %s1844_s28, 4  ;;  %s1614_s8 = int_to_ptr.vmem [resolvable:$false] %s1613_s8 }
  0x54   : > { %s1615_s23 = scalar_lea.vmem %s1614_s8, 256  ;;  %p1616_p10 = scmp.lt.s32.totalorder %s2023_s4, %s1614_s8 }
  0x55   : > { %p1611_p9 = pnand %p1609_p5, %p2033_p7  ;;  %p1617_p11 = scmp.lt.s32.totalorder %s1615_s23, %s1608_s20 }
  0x57   : > { %p1612_p13 = pneg %p1611_p9  ;;  %p1618_p2 = por %p1617_p11, %p1616_p10 }
  0x59   : > { %p1619_p4 = pnand %p1618_p2, %p1612_p13 }
  0x5b   : > { %1622 = shalt.err (!%p1619_p4)
}
  0x5c   : > { %1450 = dma.hbm_to_vmem [thread:$0]  (!%p2011_p3), %s2020_s12, 128, %s2023_s4, %s2027_s13  }
  0x5d   : > { %s1845_s30 = smov [#allocation14]   ;;  %s1623_s28 = scalar_lea.hbm %s2402_s5, 16 }
  0x5e   : > { %s263_s11 = sshll.u32 %s1845_s30, 4  ;;  %p1624_p11 = scmp.ne.s32.totalorder %s2402_s5, %s1623_s28  ;;  %s264_s11 = int_to_ptr.vmem [resolvable:$true] %s263_s11 }
  0x5f   : > { %p2437_p13 = scmp.ne.s32.totalorder %s2428_s10, 0  ;;  %p1630_p8 = scmp.lt.u32.totalorder %s1623_s28, %s2402_s5 }
  0x61   : > { %p2438_p10 = pneg %p2437_p13 }
  0x63   : > { %p1626_p1 = pnand %p1624_p11, %p2438_p10 }
  0x65   : > { %p1627_p6 = pneg %p1626_p1 }
  0x67   : > { %p1632_p12 = pnand %p1630_p8, %p1627_p6 }
  0x69   : > { %1635 = shalt.err (!%p1632_p12)
}
  0x6a   : > { %s1636_s4 = scalar_lea.vmem %s264_s11, 16  ;;  %p2439_p5 = pmov %p2438_p10 }
  0x6b   : > { %p1637_p0 = scmp.ne.s32.totalorder %s264_s11, %s1636_s4  ;;  %s1643_s1 = scalar_lea.vmem %s264_s11, 32 }
  0x6c   : > { %p1644_p4 = scmp.lt.s32.totalorder %s264_s11, %s264_s11  ;;  %p1645_p3 = scmp.lt.s32.totalorder %s1643_s1, %s1636_s4 }
  0x6d   : > { %p1639_p9 = pnand %p1637_p0, %p2439_p5 }
  0x6e   : > { %p1646_p7 = por %p1645_p3, %p1644_p4 }
  0x6f   : > { %p1640_p2 = pneg %p1639_p9 }
  0x71   : > { %p1647_p10 = pnand %p1646_p7, %p1640_p2 }
  0x73   : > { %1650 = shalt.err (!%p1647_p10)
}
  0x74   : > { %1443 = dma.hbm_to_vmem [thread:$0]  (!%p2437_p13), %s2402_s5, 16, %s264_s11, [#allocation15]  }
  0x75   : > { %s2081_s28 = scalar_lea.hbm %s2397_s0, %s2006_s17  ;;  %s278_s8 = scalar_lea.vmem [#allocation5], %s2003_s9 }
  0x76   : > { %s286_s20 = sshll.u32 %s278_s8, 4  ;;  %s275_s10 = scalar_lea.sflag [#allocation6], %s2000_s16  ;;  %s287_s20 = int_to_ptr.vmem [resolvable:$true] %s286_s20 }
  0x77   : > { %s1651_s23 = scalar_lea.hbm %s2081_s28, 128  ;;  %p2440_p7 = scmp.ne.s32.totalorder %s2436_s18, 0 }
  0x78   : > { %p1652_p3 = scmp.ne.s32.totalorder %s2081_s28, %s1651_s23  ;;  %s1656_s1 = scalar_lea.hbm %s2397_s0, 256 }
  0x79   : > { %p1657_p13 = scmp.lt.u32.totalorder %s2081_s28, %s2397_s0  ;;  %p1658_p6 = scmp.lt.u32.totalorder %s1656_s1, %s1651_s23 }
  0x7a   : > { %p1654_p11 = pnand %p1652_p3, %p2440_p7  ;;  %p1660_p12 = scmp.lt.u32.totalorder %s1651_s23, %s2081_s28 }
  0x7b   : > { %p1659_p8 = por %p1658_p6, %p1657_p13 }
  0x7c   : > { %p1655_p1 = pneg %p1654_p11 }
  0x7d   : > { %p1661_p0 = por %p1660_p12, %p1659_p8 }
  0x7f   : > { %p1662_p5 = pnand %p1661_p0, %p1655_p1 }
  0x81   : > { %1665 = shalt.err (!%p1662_p5)
}
  0x82   : > { %s1666_s30 = scalar_lea.vmem %s287_s20, 128  ;;  %s1846_s15 = smov [#allocation5]  }
  0x83   : > { %p1667_p9 = scmp.ne.s32.totalorder %s287_s20, %s1666_s30  ;;  %s1671_s8 = sshll.u32 %s1846_s15, 4  ;;  %s1672_s8 = int_to_ptr.vmem [resolvable:$false] %s1671_s8 }
  0x84   : > { %s1673_s4 = scalar_lea.vmem %s1672_s8, 256  ;;  %p1674_p10 = scmp.lt.s32.totalorder %s287_s20, %s1672_s8 }
  0x85   : > { %p1669_p2 = pnand %p1667_p9, %p2440_p7  ;;  %p1675_p3 = scmp.lt.s32.totalorder %s1673_s4, %s1666_s30 }
  0x87   : > { %p1670_p4 = pneg %p1669_p2  ;;  %p1676_p11 = por %p1675_p3, %p1674_p10 }
  0x89   : > { %p1677_p6 = pnand %p1676_p11, %p1670_p4 }
  0x8b   : > { %1680 = shalt.err (!%p1677_p6)
}
  0x8c   : > { %p2441_p13 = scmp.ne.s32.totalorder %s2434_s19, 0  ;;  %s2106_s1 = scalar_lea.hbm %s2399_s2, %s2006_s17 }
  0x8d   : > { %s316_s21 = scalar_lea.vmem [#allocation10], %s2003_s9  ;;  %s1318_s30 = sshll.u32 %s2000_s16, 1 }
  0x8e   : > { %1447 = dma.hbm_to_vmem [thread:$0]  (!%p2441_p13), %s2081_s28, 128, %s287_s20, %s275_s10  }
  0x8f   : > { %s324_s12 = sshll.u32 %s316_s21, 4  ;;  %s1681_s15 = scalar_lea.hbm %s2106_s1, 128  ;;  %s325_s12 = int_to_ptr.vmem [resolvable:$true] %s324_s12 }
  0x90   : > { %p1682_p1 = scmp.ne.s32.totalorder %s2106_s1, %s1681_s15  ;;  %s1686_s20 = scalar_lea.hbm %s2399_s2, 256 }
  0x91   : > { %p1687_p0 = scmp.lt.u32.totalorder %s2106_s1, %s2399_s2  ;;  %p1688_p5 = scmp.lt.u32.totalorder %s1686_s20, %s1681_s15 }
  0x92   : > { %p1684_p8 = pnand %p1682_p1, %p2440_p7  ;;  %p1690_p2 = scmp.lt.u32.totalorder %s1681_s15, %s2106_s1 }
  0x93   : > { %p1689_p9 = por %p1688_p5, %p1687_p0 }
  0x94   : > { %p1685_p12 = pneg %p1684_p8 }
  0x95   : > { %p1691_p4 = por %p1690_p2, %p1689_p9 }
  0x97   : > { %p1692_p10 = pnand %p1691_p4, %p1685_p12 }
  0x99   : > { %1695 = shalt.err (!%p1692_p10)
}
  0x9a   : > { %s1696_s9 = scalar_lea.vmem %s325_s12, 128  ;;  %s1847_s4 = smov [#allocation10]  }
  0x9b   : > { %p1697_p3 = scmp.ne.s32.totalorder %s325_s12, %s1696_s9  ;;  %s1701_s23 = sshll.u32 %s1847_s4, 4  ;;  %s1702_s23 = int_to_ptr.vmem [resolvable:$false] %s1701_s23 }
  0x9c   : > { %s1703_s11 = scalar_lea.vmem %s1702_s23, 256  ;;  %p1704_p1 = scmp.lt.s32.totalorder %s325_s12, %s1702_s23 }
  0x9d   : > { %p1699_p11 = pnand %p1697_p3, %p2440_p7  ;;  %p1705_p8 = scmp.lt.s32.totalorder %s1703_s11, %s1696_s9 }
  0x9f   : > { %p1700_p6 = pneg %p1699_p11  ;;  %p1706_p13 = por %p1705_p8, %p1704_p1 }
  0xa1   : > { %p1707_p0 = pnand %p1706_p13, %p1700_p6 }
  0xa3   : > { %1710 = shalt.err (!%p1707_p0)
}
  0xa4   : > { %p2442_p5 = scmp.ne.s32.totalorder %s2434_s19, 0  ;;  %s1319_s21 = sshll.u32 %s1835_s25, 5 }
  0xa5   : > { %s2132_s28 = scalar_lea.hbm %s2400_s3, %s1319_s21  ;;  %s335_s20 = scalar_lea.vmem [#allocation11], %s1318_s30 }
  0xa6   : > { %1453 = dma.hbm_to_vmem [thread:$0]  (!%p2442_p5), %s2106_s1, 128, %s325_s12, %s2027_s13  }
  0xa7   : > { %s344_s10 = sshll.u32 %s335_s20, 4  ;;  %s2443_s17 = sand.u32 1, %s1839_s26   ;;  %s345_s10 = int_to_ptr.vmem [resolvable:$true] %s344_s10 }
  0xa8   : > { %s332_s9 = scalar_lea.sflag [#allocation12], %s2443_s17  ;;  %s1711_s4 = scalar_lea.hbm %s2132_s28, 32 }
  0xa9   : > { %p1712_p13 = scmp.ne.s32.totalorder %s2132_s28, %s1711_s4  ;;  %s1716_s12 = scalar_lea.hbm %s2400_s3, 64 }
  0xaa   : > { %p1717_p2 = scmp.lt.u32.totalorder %s2132_s28, %s2400_s3  ;;  %p1718_p4 = scmp.lt.u32.totalorder %s1716_s12, %s1711_s4 }
  0xab   : > { %p1714_p12 = pnand %p1712_p13, %p2440_p7  ;;  %p1720_p3 = scmp.lt.u32.totalorder %s1711_s4, %s2132_s28 }
  0xac   : > { %p1719_p10 = por %p1718_p4, %p1717_p2 }
  0xad   : > { %p1715_p9 = pneg %p1714_p12 }
  0xae   : > { %p1721_p11 = por %p1720_p3, %p1719_p10 }
  0xb0   : > { %p1722_p6 = pnand %p1721_p11, %p1715_p9 }
  0xb2   : > { %1725 = shalt.err (!%p1722_p6)
}
  0xb3   : > { %s1726_s30 = scalar_lea.vmem %s345_s10, 32  ;;  %s1848_s11 = smov [#allocation11]  }
  0xb4   : > { %p1727_p1 = scmp.ne.s32.totalorder %s345_s10, %s1726_s30  ;;  %s1731_s21 = sshll.u32 %s1848_s11, 4  ;;  %s1732_s21 = int_to_ptr.vmem [resolvable:$false] %s1731_s21 }
  0xb5   : > { %s1733_s15 = scalar_lea.vmem %s1732_s21, 64  ;;  %p1734_p13 = scmp.lt.s32.totalorder %s345_s10, %s1732_s21 }
  0xb6   : > { %p1729_p8 = pnand %p1727_p1, %p2440_p7  ;;  %p1735_p12 = scmp.lt.s32.totalorder %s1733_s15, %s1726_s30 }
  0xb8   : > { %p1730_p0 = pneg %p1729_p8  ;;  %p1736_p5 = por %p1735_p12, %p1734_p13 }
  0xba   : > { %p1737_p2 = pnand %p1736_p5, %p1730_p0 }
  0xbc   : > { %1740 = shalt.err (!%p1737_p2)
}
  0xbd   : > { %p2444_p4 = scmp.ne.s32.totalorder %s2434_s19, 0  ;;  %p2445_p9 = scmp.ne.s32.totalorder %s2427_s7, 0 }
  0xbe   : > { %s2158_s18 = sand.u32 (!%p2445_p9), 1, %s1823_s22   ;;  %p2446_p7 = scmp.ne.s32.totalorder (!%p2445_p9), %s2424_s29, 0 }
  0xbf   : > { %1456 = dma.hbm_to_vmem [thread:$0]  (!%p2444_p4), %s2132_s28, 32, %s345_s10, %s332_s9  }
  0xc0   : > { %353 = sbr.rel (%p2445_p9) target bundleno = 1879 (0x757), region = 44  ;;  %s2161_s8 = sshll.u32 (!%p2445_p9), %s2158_s18, 3 }
  0xc1   : > { %s356_s20 = scalar_lea.sflag (!%p2445_p9), [#allocation6], %s2158_s18  ;;  %s359_s17 = scalar_lea.vmem (!%p2445_p9), [#allocation5], %s2161_s8 }
  0xc7   : > { %1794 = dma.done.wait (%p2446_p7), %s356_s20, 128  }
  0xc8   : > { %1796 = vsyncadd (%p2446_p7), %s356_s20, 4294967168  ;;  %s364_s7 = sand.u32 1, %s1929_s27   ;;  %s368_s28 = scalar_lea.vmem [#allocation8], %s2161_s8 }
  0xc9   : > { %s365_s19 = scalar_lea.sflag [#allocation9], %s364_s7 }
  0xca   : > { %1798 = dma.done.wait (%p2446_p7), %s365_s19, 256  }
  0xcb   : > { %1800 = vsyncadd (%p2446_p7), %s365_s19, 4294967040  ;;  %s1324_s10 = sshll.u32 %s2158_s18, 1  ;;  %s377_s9 = scalar_lea.vmem [#allocation10], %s2161_s8 }
  0xcc   : > { %s383_s4 = scalar_lea.sflag [#allocation12], %s364_s7  ;;  %s386_s13 = scalar_lea.vmem [#allocation11], %s1324_s10 }
  0xcd   : > { %1802 = dma.done.wait (%p2446_p7), %s383_s4, 32  }
  0xce   : > { %1804 = vsyncadd (%p2446_p7), %s383_s4, 4294967264  ;;  %p2447_p5 = scmp.eq.s32.totalorder %s1929_s27, 0 }
  0xd0   : > { %1806 = dma.done.wait (%p2447_p5), [#allocation12], 256   ;;  %p2448_p10 = pmov %p2447_p5 }
  0xd1   : > { %p2449_p3 = pmov %p2447_p5 }
  0xd2   : > { %1808 = vsyncadd (%p2448_p10), [#allocation12], 4294967040 }
  0xd3   : > { %1810 = dma.done.wait (%p2449_p3), [#allocation15], 16   ;;  %p2450_p11 = pmov %p2449_p3 }
  0xd4   : > { %v1849_v0 = vmov 0.0   ;;  %vm1850_vm0 = vmmov 0   ;;  %v451_v1 = vld [vmem:[%s368_s28] sm:$0xff]  ;;  %vm460_vm1 = vcmask 64512   ;;  %v448_v2 = vld [vmem:[%s359_s17] sm:$0xff]  ;;  %vm443_vm2 = vcmask 31744  }
  0xd5   : > { %1812 = vsyncadd (%p2450_p11), [#allocation15], 4294967280  ;;  %1363 = vmatprep.subr.bf16.mxu0 %v1849_v0  ;;  %1365 = vmatprep.mubr.msk.bf16.mxu0 %vm1850_vm0, %v1849_v0  ;;  %v452_v3 = vpack.c.bf16 %v451_v1, %v451_v1  ;;  %v449_v5 = vmul.f32 0.17677669, %v448_v2  ;;  %v1851_v7 = vmov -1e+30  }
  0xd6   : > { %1369 = vmatprep.subr.bf16.mxu1 %v1849_v0  ;;  %1371 = vmatprep.mubr.msk.bf16.mxu1 %vm1850_vm0, %v1849_v0  ;;  %444 = vst.msk [vmem:[#allocation2] sm:$0xff] %vm443_vm2, %v1851_v7  ;;  %445 = vst.msk [vmem:[#allocation3] sm:$0xff] %vm443_vm2, %v1849_v0  ;;  %v455_v8 = vld [vmem:[%s386_s13] sm:$0x3]  ;;  %v1852_v18 = vmov 0   ;;  %s1853_s27 = smov 120  }
  0xd7   : > { %v465_v4 = vsel %vm460_vm1, %v452_v3, 0  ;;  %v450_v6 = vpack.c.bf16 %v449_v5, %v449_v5  ;;  %v456_v9 = vunpack.c.0.s8 %v455_v8  ;;  %1532 = vset.pattern.permute.xlu0 %v1852_v18  ;;  %593 = vrot.lane.b32.xlu1 %v452_v3, %s1853_s27  ;;  %s1854_s29 = smov 112   ;;  %s1855_s1 = smov 104   ;;  %vm529_vm4 = vcmask 7168   ;;  %v453_v23 = vld [vmem:[%s377_s9] sm:$0xff] }
  0xd8   : > { %1364 = vmatpush3.bf16.xpose.msra.mxu0 %v465_v4  ;;  %vm543_vm5 = vcmask 1043456   ;;  %v2225_v24 = vpack.c.bf16 %v453_v23, %v453_v23  ;;  %v1856_v62 = vmov 1   ;;  %v1857_v63 = vmov 2   ;;  %s1859_s12 = smov 8   ;;  %s1860_s23 = smov 16  }
  0xd9   : > { %1381 = vmatprep.subr.bf16.mxu0 %v1849_v0  ;;  %v457_v10 = vcvt.s32.f32 %v456_v9  ;;  %1533 = vset.pattern.permute.xlu1 %v1856_v62  ;;  %vm663_vm6 = vcmask 15368   ;;  %vm802_vm7 = vcmask 23568   ;;  %vm940_vm8 = vcmask 31768   ;;  %s1861_s16 = smov 24   ;;  %s1341_s30 = sshll.u32 %s1831_s24, 7 }
  0xda   : > { %v545_v25 = vsel %vm543_vm5, %v2225_v24, 0  ;;  %vm446_vm9 = vcmask 261120   ;;  %vm728_vm10 = vcmask 130112   ;;  %vm866_vm11 = vcmask 195712   ;;  %s437_s11 = scalar_lea.vmem [#allocation16], %s2161_s8  ;;  %s2347_s17 = scalar_lea.hbm %s2403_s6, %s1341_s30 }
  0xdb   : > { %vm458_vm3 = vcmp.eq.f32.partialorder %v457_v10, 0.0  ;;  %590 = vrot.lane.b32.xlu1 %v450_v6, %s1853_s27  ;;  %1370 = vmatpush3.bf16.msra.mxu1 %v545_v25  ;;  %447 = vst.msk [vmem:[#allocation4] sm:$0xff] %vm446_vm9, %v1849_v0  ;;  %vm1004_vm12 = vcmask 261312   ;;  %s1134_s21 = sshll.u32 %s437_s11, 4  ;;  %s1120_s24 = scalar_lea.sflag [#allocation7], %s2158_s18  ;;  %s2349_s21 = int_to_ptr.vmem [resolvable:$true] %s1134_s21 }
  0xdc   : > { %v2202_v11 = vsel %vm458_vm3, -1e+30, %v1849_v0  ;;  %1375 = vmatprep.subr.bf16.mxu1 %v1849_v0  ;;  %s1741_s8 = scalar_lea.vmem %s2349_s21, 128  ;;  %p2451_p1 = scmp.ne.s32.totalorder %s2432_s14, 0 }
  0xdd   : > { %v2213_v19 = vld [vmem:[#allocation2] sm:$0xff]  ;;  %p1742_p6 = scmp.ne.s32.totalorder %s2349_s21, %s1741_s8  ;;  %s1862_s7 = smov [#allocation16]  }
  0xde   : > { %s1745_s19 = sshll.u32 %s1862_s7, 4  ;;  %s1746_s19 = int_to_ptr.vmem [resolvable:$false] %s1745_s19 }
  0xdf   : > { %1366 = vmatmul.mubr.msk.bf16.vlgmr.msra.gmra.mrb[0].mxu0 %vm460_vm1, %v450_v6  ;;  %732 = vrot.lane.b32.xlu1 %v452_v3, %s1854_s29  ;;  %p1743_p8 = pnand %p1742_p6, %p2451_p1  ;;  %s1747_s28 = scalar_lea.vmem %s1746_s19, 256 }
  0xe0   : > { %1383 = vmatprep.mubr.msk.bf16.mxu0 %vm1850_vm0, %v1849_v0  ;;  %p1748_p13 = scmp.lt.s32.totalorder %s2349_s21, %s1746_s19  ;;  %p1749_p12 = scmp.lt.s32.totalorder %s1747_s28, %s1741_s8 }
  0xe1   : > { %p1744_p0 = pneg %p1743_p8 }
  0xe2   : > { %p1750_p2 = por %p1749_p12, %p1748_p13 }
  0xe3   : > { %730 = vrot.lane.b32.xlu1 %v450_v6, %s1854_s29 }
  0xe4   : > { %p1751_p4 = pnand %p1750_p2, %p1744_p0 }
  0xe7   : > { %870 = vrot.lane.b32.xlu1 %v452_v3, %s1855_s1 }
  0xeb   : > { %868 = vrot.lane.b32.xlu1 %v450_v6, %s1855_s1  ;;  %v1858_v6 = vmov 3  }
 0x149   : > { %v594_v29 = vpop.permute.xlu1 %593 }
 0x14a   : > { %v599_v32 = vsel %vm460_vm1, %v594_v29, 0 }
 0x14d   : > { %v591_v30 = vpop.permute.xlu1 %590 }
 0x151   : > { %v733_v34 = vpop.permute.xlu1 %732 }
 0x152   : > { %v738_v36 = vsel %vm460_vm1, %v733_v34, 0 }
 0x155   : > { %v731_v35 = vpop.permute.xlu1 %730 }
 0x159   : > { %v871_v37 = vpop.permute.xlu1 %870 }
 0x15a   : > { %v876_v38 = vsel %vm460_vm1, %v871_v37, 0 }
 0x15d   : > { %v869_v39 = vpop.permute.xlu1 %868 }
 0x1b2   : > { %v501_v12 = vpop.f32.mrb[0].mxu0 }
 0x1b3   : > { %v502_v13 = vadd.f32 %v501_v12, %v2202_v11  ;;  %v1367_v14 = vpop.f32.mrb[1].mxu0 }
 0x1b4   : > { %v504_v15 = vpop.f32.mrb[2].mxu0 }
 0x1b5   : > { %v1368_v16 = vpop.f32.mrb[3].mxu0  ;;  %v509_v17 = vsel %vm460_vm1, %v502_v13, -inf }
 0x1b6   : > { %510 = vmax.xlane.f32.xlu0 %v509_v17 }
 0x243   : > { %v511_v20 = vpop.xlane.xlu0 %510 }
 0x244   : > { %v2216_v21 = vmax.f32 %v2213_v19, %v511_v20 }
 0x246   : > { %v513_v22 = vsub.f32 %v2213_v19, %v2216_v21  ;;  %531 = vst.msk [vmem:[#allocation2] sm:$0xff] %vm529_vm4, %v2216_v21  ;;  %518 = vperm.xlu0 %1532, %v2216_v21  }
 0x24a   : > { %1534 = vset.pattern.permute.xlu0 %v1857_v63 }
 0x24d   : > { %v641_v2 = vld [vmem:[#allocation2] sm:$0xff] }
 0x2c5   : > { %v519_v26 = vpop.permute.xlu0 %518 }
 0x2c6   : > { %v521_v27 = vsub.f32 %v502_v13, %v519_v26 }
 0x2c8   : > { %v522_v28 = vmul.f32 1.442695, %v521_v27 }
 0x2ca   : > { %1547 = vpow2.f32 %v522_v28 }
 0x2d4   : > { %v2230_v31 = vpop.eup %1547 }
 0x2d5   : > { %v539_v33 = vpack.c.bf16 %v2230_v31, %v2230_v31  ;;  %v525_v14 = vsel %vm460_vm1, %v2230_v31, 0.0 }
 0x2d7   : > { %1372 = vmatmul.mubr.msk.bf16.vlgmr.msra.gmra.mrb[0].mxu1 %vm460_vm1, %v539_v33 }
 0x2d8   : > { %1376 = vmatpush3.bf16.xpose.msra.mxu1 %v599_v32  ;;  %1377 = vmatprep.mubr.msk.bf16.mxu1 %vm1850_vm0, %v1849_v0 }
 0x2d9   : > { %1387 = vmatprep.subr.bf16.mxu1 %v1849_v0 }
 0x2df   : > { %1378 = vmatmul.mubr.msk.bf16.vlgmr.msra.gmra.mrb[4].mxu1 %vm460_vm1, %v591_v30 }
 0x2e0   : > { %1388 = vmatpush3.bf16.xpose.msra.mxu1 %v738_v36  ;;  %1389 = vmatprep.mubr.msk.bf16.mxu1 %vm1850_vm0, %v1849_v0 }
 0x2e1   : > { %1399 = vmatprep.subr.bf16.mxu1 %v1849_v0 }
 0x2e7   : > { %1390 = vmatmul.mubr.msk.bf16.vlgmr.msra.gmra.mrb[8].mxu1 %vm460_vm1, %v731_v35 }
 0x2e8   : > { %1400 = vmatpush3.bf16.xpose.msra.mxu1 %v876_v38  ;;  %1401 = vmatprep.mubr.msk.bf16.mxu1 %vm1850_vm0, %v1849_v0 }
 0x2e9   : > { %1411 = vmatprep.subr.bf16.mxu1 %v1849_v0 }
 0x2ef   : > { %1402 = vmatmul.mubr.msk.bf16.vlgmr.msra.gmra.mrb[12].mxu1 %vm460_vm1, %v869_v39 }
 0x2f0   : > { %1415 = vmatprep.mubr.msk.bf16.mxu1 %vm1850_vm0, %v1849_v0 }
 0x3aa   : > { %v2252_v40 = vpop.f32.mrb[0].mxu1 }
 0x3ab   : > { %v1373_v41 = vpop.f32.mrb[1].mxu1 }
 0x3ac   : > { %v584_v42 = vpop.f32.mrb[2].mxu1 }
 0x3ad   : > { %v1374_v43 = vpop.f32.mrb[3].mxu1 }
 0x3b2   : > { %v635_v44 = vpop.f32.mrb[4].mxu1 }
 0x3b3   : > { %v636_v45 = vadd.f32 %v635_v44, %v2202_v11  ;;  %v1379_v46 = vpop.f32.mrb[5].mxu1 }
 0x3b4   : > { %v638_v47 = vpop.f32.mrb[6].mxu1  ;;  %v514_v46 = vmul.f32 1.442695, %v513_v22 }
 0x3b5   : > { %v1380_v48 = vpop.f32.mrb[7].mxu1  ;;  %v643_v49 = vsel %vm460_vm1, %v636_v45, -inf }
 0x3b6   : > { %644 = vmax.xlane.f32.xlu1 %v643_v49  ;;  %v508_v48 = vld [vmem:[#allocation3] sm:$0xff] }
 0x3ba   : > { %v774_v50 = vpop.f32.mrb[8].mxu1 }
 0x3bb   : > { %v775_v51 = vadd.f32 %v774_v50, %v2202_v11  ;;  %v1391_v52 = vpop.f32.mrb[9].mxu1 }
 0x3bc   : > { %v777_v53 = vpop.f32.mrb[10].mxu1 }
 0x3bd   : > { %v1392_v54 = vpop.f32.mrb[11].mxu1  ;;  %v782_v55 = vsel %vm460_vm1, %v775_v51, -inf }
 0x3be   : > { %783 = vmax.xlane.f32.xlu0 %v782_v55 }
 0x3c2   : > { %v912_v56 = vpop.f32.mrb[12].mxu1 }
 0x3c3   : > { %v913_v57 = vadd.f32 %v912_v56, %v2202_v11  ;;  %v1403_v58 = vpop.f32.mrb[13].mxu1 }
 0x3c4   : > { %v915_v59 = vpop.f32.mrb[14].mxu1 }
 0x3c5   : > { %v1404_v60 = vpop.f32.mrb[15].mxu1  ;;  %v920_v61 = vsel %vm460_vm1, %v913_v57, -inf }
 0x3c6   : > { %921 = vmax.xlane.f32.xlu1 %v920_v61 }
 0x443   : > { %v645_v1 = vpop.xlane.xlu1 %644 }
 0x444   : > { %v646_v3 = vmax.f32 %v641_v2, %v645_v1 }
 0x446   : > { %v647_v4 = vsub.f32 %v641_v2, %v646_v3  ;;  %665 = vst.msk [vmem:[#allocation2] sm:$0xff] %vm663_vm6, %v646_v3  ;;  %652 = vperm.xlu1 %1533, %v646_v3   ;;  %v532_v2 = vld [vmem:[#allocation4] sm:$0xff] }
 0x448   : > { %v648_v33 = vmul.f32 1.442695, %v647_v4 }
 0x44a   : > { %675 = vrot.lane.b32.xlu1 %v2225_v24, %s1853_s27 }
 0x44b   : > { %v784_v5 = vpop.xlane.xlu0 %783  ;;  %1535 = vset.pattern.permute.xlu1 %v1858_v6 }
 0x44d   : > { %v2266_v7 = vld [vmem:[#allocation2] sm:$0xff] }
 0x44e   : > { %v2269_v8 = vmax.f32 %v2266_v7, %v784_v5 }
 0x450   : > { %v786_v9 = vsub.f32 %v2266_v7, %v2269_v8  ;;  %804 = vst.msk [vmem:[#allocation2] sm:$0xff] %vm802_vm7, %v2269_v8  ;;  %791 = vperm.xlu0 %1534, %v2269_v8  }
 0x452   : > { %v787_v19 = vmul.f32 1.442695, %v786_v9 }
 0x453   : > { %v922_v10 = vpop.xlane.xlu1 %921 }
 0x454   : > { %1537 = vset.pattern.permute.xlu0 %v1856_v62 }
 0x457   : > { %v2277_v11 = vld [vmem:[#allocation2] sm:$0xff] }
 0x458   : > { %v2280_v12 = vmax.f32 %v2277_v11, %v922_v10 }
 0x45a   : > { %v924_v13 = vsub.f32 %v2277_v11, %v2280_v12  ;;  %942 = vst.msk [vmem:[#allocation2] sm:$0xff] %vm940_vm8, %v2280_v12  ;;  %929 = vperm.xlu1 %1535, %v2280_v12  }
 0x45c   : > { %v925_v54 = vmul.f32 1.442695, %v924_v13 }
 0x45e   : > { %813 = vrot.lane.b32.xlu1 %v2225_v24, %s1854_s29 }
 0x45f   : > { %1536 = vset.pattern.permute.xlu1 %v1852_v18 }
 0x462   : > { %951 = vrot.lane.b32.xlu1 %v2225_v24, %s1855_s1 }
 0x486   : > { %526 = vadd.xlane.f32.xlu1 %v525_v14 }
 0x4c5   : > { %v653_v15 = vpop.permute.xlu1 %652 }
 0x4c6   : > { %v655_v16 = vsub.f32 %v636_v45, %v653_v15 }
 0x4c8   : > { %v656_v17 = vmul.f32 1.442695, %v655_v16 }
 0x4c9   : > { %v676_v20 = vpop.permute.xlu1 %675 }
 0x4ca   : > { %1549 = vpow2.f32 %v656_v17  ;;  %v681_v23 = vsel %vm543_vm5, %v676_v20, 0 }
 0x4cb   : > { %1382 = vmatpush3.bf16.msra.mxu0 %v681_v23 }
 0x4cc   : > { %1393 = vmatprep.subr.bf16.mxu0 %v1849_v0 }
 0x4cf   : > { %v792_v25 = vpop.permute.xlu0 %791 }
 0x4d0   : > { %v794_v26 = vsub.f32 %v775_v51, %v792_v25 }
 0x4d2   : > { %v795_v27 = vmul.f32 1.442695, %v794_v26 }
 0x4d4   : > { %v1550_v28 = vpop.eup %1549  ;;  %1551 = vpow2.f32 %v795_v27  ;;  %v1545_v27 = vld [vmem:[#allocation13] sm:$0xff]  }
 0x4d5   : > { %v659_v24 = vsel %vm460_vm1, %v1550_v28, 0.0  ;;  %v673_v29 = vpack.c.bf16 %v1550_v28, %v1550_v28  ;;  %1412 = vmatpush3.bf16.msra.mxu1 %v1545_v27  ;;  %v1546_v28 = vld [vmem:[#allocation13 + $0x8] sm:$0xff]  }
 0x4d6   : > { %660 = vadd.xlane.f32.xlu0 %v659_v24  ;;  %1413 = vmatprep.subr.bf16.mxu1 %v1849_v0 }
 0x4d7   : > { %1384 = vmatmul.mubr.msk.bf16.vlgmr.msra.gmra.mrb[4].mxu0 %vm460_vm1, %v673_v29 }
 0x4d8   : > { %1395 = vmatprep.mubr.msk.bf16.mxu0 %vm1850_vm0, %v1849_v0 }
 0x4d9   : > { %v930_v30 = vpop.permute.xlu1 %929  ;;  %1414 = vmatpush3.bf16.msra.mxu1 %v1546_v28 }
 0x4da   : > { %v932_v31 = vsub.f32 %v913_v57, %v930_v30 }
 0x4dc   : > { %v933_v32 = vmul.f32 1.442695, %v932_v31 }
 0x4dd   : > { %v814_v34 = vpop.permute.xlu1 %813 }
 0x4de   : > { %v1552_v35 = vpop.eup %1551  ;;  %1553 = vpow2.f32 %v933_v32  ;;  %v819_v36 = vsel %vm543_vm5, %v814_v34, 0 }
 0x4df   : > { %1394 = vmatpush3.bf16.msra.mxu0 %v819_v36  ;;  %v798_v37 = vsel %vm460_vm1, %v1552_v35, 0.0  ;;  %v812_v38 = vpack.c.bf16 %v1552_v35, %v1552_v35  ;;  %1555 = vpow2.f32 %v648_v33 }
 0x4e0   : > { %799 = vadd.xlane.f32.xlu1 %v798_v37  ;;  %1405 = vmatprep.subr.bf16.mxu0 %v1849_v0  ;;  %1557 = vpow2.f32 %v514_v46 }
 0x4e1   : > { %v952_v39 = vpop.permute.xlu1 %951  ;;  %1559 = vpow2.f32 %v787_v19 }
 0x4e2   : > { %1396 = vmatmul.mubr.msk.bf16.vlgmr.msra.gmra.mrb[8].mxu0 %vm460_vm1, %v812_v38  ;;  %v957_v41 = vsel %vm543_vm5, %v952_v39, 0  ;;  %1561 = vpow2.f32 %v925_v54 }
 0x4e3   : > { %1406 = vmatpush3.bf16.msra.mxu0 %v957_v41  ;;  %1407 = vmatprep.mubr.msk.bf16.mxu0 %vm1850_vm0, %v1849_v0 }
 0x4e8   : > { %v1554_v42 = vpop.eup %1553 }
 0x4e9   : > { %v936_v43 = vsel %vm460_vm1, %v1554_v42, 0.0  ;;  %v950_v44 = vpack.c.bf16 %v1554_v42, %v1554_v42  ;;  %v1556_v45 = vpop.eup %1555 }
 0x4ea   : > { %937 = vadd.xlane.f32.xlu1 %v936_v43  ;;  %v1558_v47 = vpop.eup %1557 }
 0x4eb   : > { %1408 = vmatmul.mubr.msk.bf16.vlgmr.msra.gmra.mrb[12].mxu0 %vm460_vm1, %v950_v44  ;;  %v524_v49 = vmul.f32 %v1558_v47, %v508_v48  ;;  %v1560_v55 = vpop.eup %1559 }
 0x4ec   : > { %669 = vperm.xlu0 %1537, %v1556_v45   ;;  %v1562_v61 = vpop.eup %1561 }
 0x4f0   : > { %1544 = vset.pattern.permute.xlu0 %v1858_v6 }
 0x4fb   : > { %535 = vperm.xlu1 %1536, %v1558_v47  }
 0x4ff   : > { %1538 = vset.pattern.permute.xlu1 %v1857_v63 }
 0x513   : > { %v527_v50 = vpop.xlane.xlu1 %526 }
 0x514   : > { %v528_v51 = vadd.f32 %v527_v50, %v524_v49 }
 0x516   : > { %530 = vst.msk [vmem:[#allocation3] sm:$0xff] %vm529_vm4, %v528_v51 }
 0x51d   : > { %v642_v21 = vld [vmem:[#allocation3] sm:$0xff] }
 0x51e   : > { %v658_v22 = vmul.f32 %v1556_v45, %v642_v21  ;;  %v1336_v21 = vld [vmem:[#allocation14] ss:$0 sm:$0xff] }
 0x563   : > { %v661_v52 = vpop.xlane.xlu0 %660 }
 0x564   : > { %v662_v53 = vadd.f32 %v661_v52, %v658_v22 }
 0x566   : > { %664 = vst.msk [vmem:[#allocation3] sm:$0xff] %vm663_vm6, %v662_v53 }
 0x56b   : > { %v670_v24 = vpop.permute.xlu0 %669 }
 0x56d   : > { %v781_v56 = vld [vmem:[#allocation3] sm:$0xff]  ;;  %v800_v58 = vpop.xlane.xlu1 %799 }
 0x56e   : > { %v797_v57 = vmul.f32 %v1560_v55, %v781_v56 }
 0x570   : > { %v801_v59 = vadd.f32 %v800_v58, %v797_v57 }
 0x572   : > { %803 = vst.msk [vmem:[#allocation3] sm:$0xff] %vm802_vm7, %v801_v59 }
 0x577   : > { %v938_v60 = vpop.xlane.xlu1 %937 }
 0x579   : > { %v919_v1 = vld [vmem:[#allocation3] sm:$0xff] }
 0x57a   : > { %v935_v3 = vmul.f32 %v1562_v61, %v919_v1 }
 0x57b   : > { %v536_v4 = vpop.permute.xlu1 %535 }
 0x57c   : > { %v939_v5 = vadd.f32 %v938_v60, %v935_v3  ;;  %v538_v7 = vmul.f32 %v536_v4, %v532_v2 }
 0x57e   : > { %941 = vst.msk [vmem:[#allocation3] sm:$0xff] %vm940_vm8, %v939_v5  ;;  %v587_v8 = vadd.f32 %v2252_v40, %v538_v7 }
 0x580   : > { %588 = vst.msk [vmem:[#allocation4] sm:$0xff] %vm460_vm1, %v587_v8 }
 0x585   : > { %v1009_v14 = vld [vmem:[#allocation3] sm:$0xff] }
 0x586   : > { %1563 = vrcp.f32 %v1009_v14 }
 0x590   : > { %v1564_v26 = vpop.eup %1563 }
 0x5aa   : > { %v717_v9 = vpop.f32.mrb[4].mxu0 }
 0x5ab   : > { %v1385_v10 = vpop.f32.mrb[5].mxu0  ;;  %724 = vrot.lane.b32.xlu1 %v717_v9, %s1859_s12 }
 0x5ac   : > { %v720_v11 = vpop.f32.mrb[6].mxu0 }
 0x5ad   : > { %v1386_v12 = vpop.f32.mrb[7].mxu0 }
 0x5af   : > { %808 = vperm.xlu1 %1538, %v1560_v55  }
 0x5b3   : > { %1539 = vset.pattern.permute.xlu1 %v1858_v6 }
 0x5b5   : > { %v855_v13 = vpop.f32.mrb[8].mxu0 }
 0x5b6   : > { %v1397_v15 = vpop.f32.mrb[9].mxu0  ;;  %862 = vrot.lane.b32.xlu1 %v855_v13, %s1860_s23 }
 0x5b7   : > { %v858_v16 = vpop.f32.mrb[10].mxu0 }
 0x5b8   : > { %v1398_v17 = vpop.f32.mrb[11].mxu0 }
 0x5ba   : > { %946 = vperm.xlu1 %1539, %v1562_v61  }
 0x5be   : > { %v993_v40 = vpop.f32.mrb[12].mxu0  ;;  %1540 = vset.pattern.permute.xlu1 %v1852_v18  ;;  %v666_v18 = vld [vmem:[#allocation4] sm:$0xff] }
 0x5bf   : > { %v1409_v20 = vpop.f32.mrb[13].mxu0  ;;  %1000 = vrot.lane.b32.xlu1 %v993_v40, %s1861_s16  ;;  %v672_v29 = vmul.f32 %v670_v24, %v666_v18 }
 0x5c0   : > { %v996_v23 = vpop.f32.mrb[14].mxu0 }
 0x5c1   : > { %v1410_v25 = vpop.f32.mrb[15].mxu0 }
 0x5c3   : > { %1014 = vperm.xlu1 %1540, %v1564_v26  }
 0x5c7   : > { %1541 = vset.pattern.permute.xlu1 %v1856_v62 }
 0x5c8   : > { %1024 = vperm.xlu1 %1541, %v1564_v26  }
 0x5cc   : > { %1542 = vset.pattern.permute.xlu1 %v1857_v63 }
 0x5cd   : > { %1034 = vperm.xlu1 %1542, %v1564_v26  }
 0x5d1   : > { %1543 = vset.pattern.permute.xlu1 %v1858_v6 }
 0x5d2   : > { %1044 = vperm.xlu1 %1543, %v1564_v26  }
 0x61d   : > { %v725_v30 = vpop.permute.xlu1 %724 }
 0x61e   : > { %v727_v31 = vadd.f32 %v725_v30, %v672_v29 }
 0x620   : > { %729 = vst.msk [vmem:[#allocation4] sm:$0xff] %vm728_vm10, %v727_v31 }
 0x627   : > { %v805_v63 = vld [vmem:[#allocation4] sm:$0xff] }
 0x62e   : > { %v809_v62 = vpop.permute.xlu1 %808 }
 0x62f   : > { %v811_v32 = vmul.f32 %v809_v62, %v805_v63 }
 0x632   : > { %v863_v6 = vpop.permute.xlu1 %862 }
 0x633   : > { %v865_v33 = vadd.f32 %v863_v6, %v811_v32 }
 0x635   : > { %867 = vst.msk [vmem:[#allocation4] sm:$0xff] %vm866_vm11, %v865_v33 }
 0x639   : > { %v947_v34 = vpop.permute.xlu1 %946 }
 0x63c   : > { %v943_v35 = vld [vmem:[#allocation4] sm:$0xff] }
 0x63d   : > { %v949_v0 = vmul.f32 %v947_v34, %v943_v35  ;;  %v1001_v36 = vpop.permute.xlu1 %1000 }
 0x63f   : > { %v1003_v37 = vadd.f32 %v1001_v36, %v949_v0 }
 0x641   : > { %1005 = vst.msk [vmem:[#allocation4] sm:$0xff] %vm1004_vm12, %v1003_v37 }
 0x642   : > { %v1015_v39 = vpop.permute.xlu1 %1014 }
 0x647   : > { %v1025_v43 = vpop.permute.xlu1 %1024 }
 0x648   : > { %v1011_v38 = vld [vmem:[#allocation4] sm:$0xff] }
 0x649   : > { %v1017_v41 = vmul.f32 %v1015_v39, %v1011_v38 }
 0x64b   : > { %1018 = vst.msk [vmem:[#allocation4] sm:$0xff] %vm460_vm1, %v1017_v41 }
 0x64c   : > { %v1035_v46 = vpop.permute.xlu1 %1034 }
 0x651   : > { %v1045_v49 = vpop.permute.xlu1 %1044 }
 0x652   : > { %v1021_v42 = vld [vmem:[#allocation4] sm:$0xff] }
 0x653   : > { %v1027_v44 = vmul.f32 %v1025_v43, %v1021_v42 }
 0x655   : > { %1028 = vst.msk [vmem:[#allocation4] sm:$0xff] %vm728_vm10, %v1027_v44 }
 0x65c   : > { %v1031_v45 = vld [vmem:[#allocation4] sm:$0xff] }
 0x65d   : > { %v1037_v47 = vmul.f32 %v1035_v46, %v1031_v45 }
 0x65f   : > { %1038 = vst.msk [vmem:[#allocation4] sm:$0xff] %vm866_vm11, %v1037_v47 }
 0x666   : > { %v1041_v48 = vld [vmem:[#allocation4] sm:$0xff] }
 0x667   : > { %v1047_v50 = vmul.f32 %v1045_v49, %v1041_v48 }
 0x669   : > { %1048 = vst.msk [vmem:[#allocation4] sm:$0xff] %vm1004_vm12, %v1047_v50 }
 0x670   : > { %v1049_v51 = vld [vmem:[#allocation4] sm:$0xff] }
 0x671   : > { %v1050_v19 = vpack.c.bf16 %v1049_v51, %v1049_v51 }
 0x673   : > { %1416 = vmatmul.mubr.msk.bf16.vlgmr.msra.gmra.mrb[16].mxu1 %vm446_vm9, %v1050_v19 }
 0x746   : > { %v1112_v22 = vpop.f32.mrb[16].mxu1 }
 0x747   : > { %v1113_v52 = vadd.f32 %v1336_v21, %v1112_v22  ;;  %v1417_v53 = vpop.f32.mrb[17].mxu1 }
 0x748   : > { %v1115_v54 = vpop.f32.mrb[18].mxu1 }
 0x749   : > { %v1418_v55 = vpop.f32.mrb[19].mxu1  ;;  %1118 = vst.msk [vmem:[%s437_s11] sm:$0xff] %vm446_vm9, %v1113_v52 }
 0x74a   : > { %1754 = shalt.err (!%p1751_p4)
}
 0x74b   : > { %s1755_s18 = scalar_lea.hbm %s2347_s17, 128  ;;  %s1759_s4 = scalar_lea.hbm %s2403_s6, 256 }
 0x74c   : > { %p1756_p9 = scmp.ne.s32.totalorder %s2347_s17, %s1755_s18  ;;  %p1760_p10 = scmp.lt.u32.totalorder %s2347_s17, %s2403_s6 }
 0x74d   : > { %p1761_p3 = scmp.lt.u32.totalorder %s1759_s4, %s1755_s18  ;;  %p1763_p6 = scmp.lt.u32.totalorder %s1755_s18, %s2347_s17 }
 0x74e   : > { %p1757_p7 = pnand %p1756_p9, %p2451_p1 }
 0x74f   : > { %p1762_p11 = por %p1761_p3, %p1760_p10 }
 0x750   : > { %p1758_p5 = pneg %p1757_p7 }
 0x751   : > { %p1764_p8 = por %p1763_p6, %p1762_p11 }
 0x753   : > { %p1765_p0 = pnand %p1764_p8, %p1758_p5 }
 0x755   : > { %1768 = shalt.err (!%p1765_p0)
}
 0x756   : > { %1435 = dma.vmem_to_hbm [thread:$0]  (%p2451_p1), %s2349_s21, 128, %s2347_s17, %s1120_s24  }
 0x757 PF: > { %s2452_s29 = sld [smem:[#allocation23_spill]]  ;;  %s2453_s1 = sld [smem:[#allocation25_spill]] }
 0x758   : > { %p2455_p12 = scmp.ge.s32.totalorder %s1839_s26, 2 }
 0x75d   : > { %s1146_s12 = sand.u32 1, %s2452_s29   ;;  %p2454_p13 = scmp.ne.s32.totalorder %s2453_s1, 0 }
 0x75e   : > { %s1147_s23 = scalar_lea.sflag [#allocation7], %s1146_s12 }
 0x75f   : > { %p1458_p2 = pnand %p2455_p12, %p2454_p13 }
 0x761   : > { %1814 = dma.done.wait (!%p1458_p2), %s1147_s23, 128  }
 0x762   : > { %1816 = vsyncadd (!%p1458_p2), %s1147_s23, 4294967168  ;;  %s29_s26 = sadd.s32 1, %s1839_s26   ;;  %s2456_s16 = sld [smem:[#allocation24_spill]] }
 0x763   : > { %p26_p4 = scmp.ge.s32.totalorder %s29_s26, 4   ;;  %s2457_s23 = sld [smem:[#allocation27_spill]] }
 0x764   : > { %s2458_s14 = sld [smem:[#allocation26_spill]]  ;;  %s2459_s21 = smov %s1823_s22 }
 0x765   : > { %s2461_s24 = smov %s1835_s25  ;;  %28 = sbr.rel (!%p26_p4) target bundleno = 14 (0xe), region = 142 }
 0x768   : > { %s2460_s22 = smov %s2456_s16 }
 0x76a   : > { %s2462_s25 = smov %s2458_s14 }
 0x76c   :  { %1152 = vsyncpa [#allocation6], 1 }
 0x76d   :  { %1154 = vsyncpa [#allocation6 + $0x1], 1 }
 0x76e   :  { %1155 = vsyncpa [#allocation9], 1 }
 0x76f   :  { %1157 = vsyncpa [#allocation9 + $0x1], 1 }
 0x770   :  { %1158 = vsyncpa [#allocation12], 1 }
 0x771   :  { %1160 = vsyncpa [#allocation12 + $0x1], 1 }
 0x772   :  { %1161 = vsyncpa [#allocation15], 1 }
 0x773   :  { %1162 = vsyncpa [#allocation7], 1 }
 0x774   :  { %1164 = vsyncpa [#allocation7 + $0x1], 1 }

</bundles_post_ra>
